<compile_context>
chip_gen: v6e
topology: v6e:2x2x1
jax: 0.10.0
libtpu: 0.0.40
codegen_flags: <defaults>
</compile_context>

<pallas_src>
import functools

import jax
import jax.numpy as jnp
from jax.experimental import pallas as pl
from jax.experimental.pallas import tpu as pltpu

EPS = 1e-5  # torch.nn.BatchNorm2d default eps


def fused_conv_bn_kernel(x1_ref, x2_ref, w_ref, gb_ref, o_ref, p_ref,
                         *, oh_ow, ks, c_half, m):
    """Fused Conv2d (valid, stride 1) + training-mode BatchNorm2d.

    x1_ref, x2_ref : (H, W, C)   the two inputs in HWC layout (C = 3 each)
    w_ref          : (KP, CP)    im2col weight matrix; K = KH*KW*2C rows valid,
                                 Cout cols valid, zero padded to 128 x 128
    gb_ref         : (2, CP)     row 0 = gamma (padded), row 1 = beta (padded)
    o_ref          : (MP, CP)    output rows m = oh*OW + ow (rows >= M are pad)
    p_ref          : (MP, KP)    VMEM scratch for the im2col patch matrix
    """
    OH, OW = oh_ow
    KH, KW = ks
    C = c_half

    # ---- build the im2col patch matrix in VMEM (pad rows / cols stay zero) ----
    p_ref[...] = jnp.zeros_like(p_ref)
    x1v = x1_ref[...]                                     # (H, W, C)
    x2v = x2_ref[...]
    for kh in range(KH):
        for kw in range(KW):
            base = (kh * KW + kw) * (2 * C)               # concat channel order
            for oh in range(OH):
                r0 = oh * OW
                p_ref[r0:r0 + OW, base:base + C] = x1v[kh + oh, kw:kw + OW, :]
                p_ref[r0:r0 + OW, base + C:base + 2 * C] = x2v[kh + oh, kw:kw + OW, :]

    # ---- single MXU pass; result stays in vregs (no VMEM round trip) ----
    y = jnp.dot(p_ref[...], w_ref[...], preferred_element_type=jnp.float32)

    # ---- BatchNorm2d, training-mode batch statistics over the M valid rows.
    # Padded patch rows are zero -> padded y rows are zero, so sums over MP rows
    # divided by M give the correct per-channel mean / E[y^2]; padded lanes stay 0.
    inv_m = 1.0 / m
    mean = jnp.sum(y, axis=0, keepdims=True) * inv_m      # (1, CP)
    ex2 = jnp.sum(y * y, axis=0, keepdims=True) * inv_m
    var = jnp.maximum(ex2 - mean * mean, 0.0)             # clamp: cancellation insurance
    inv = jax.lax.rsqrt(var + EPS)
    a = gb_ref[0:1, :] * inv                              # gamma * inv_std
    b = gb_ref[1:2, :] - mean * a                         # beta - mean * a
    o_ref[...] = y * a + b                                # single scale + shift, one store
    # TODO(synk): torch.nn.Dropout(p=0.5, training) is stochastic; kept as identity
    # (== eval-mode dropout) so the kernel output is deterministic.


@jax.jit
def fused_forward(x1, x2, weight, gamma, beta):
    # Conv bias intentionally omitted: a per-channel constant is exactly cancelled
    # by the training-mode BatchNorm mean subtraction.
    N, C, H, W = x1.shape
    assert N == 1, "toy problem: batch 1 (matches reference inputs)"
    Cout, Cin, KH, KW = weight.shape                      # Cin == 2 * C (channel concat)
    assert Cin == 2 * C
    OH, OW = H - KH + 1, W - KW + 1                       # stride 1, no padding
    M = OH * OW
    MP = ((M + 7) // 8) * 8                               # sublane-padded rows (9 -> 16)
    KP = 128                                              # contraction pad (96 -> 128)
    CP = 128                                              # lane-padded channels (3 -> 128)
    assert KH * KW * Cin <= KP

    # ---- tiny layout prep (fused under this jit; no concat HBM round trip) ----
    x1_hwc = jnp.transpose(x1[0], (1, 2, 0)).astype(jnp.float32)   # (H, W, C)
    x2_hwc = jnp.transpose(x2[0], (1, 2, 0)).astype(jnp.float32)
    # weight (Cout, Cin, KH, KW) -> rows k = (kh*KW + kw)*Cin + c_cat (matches kernel)
    w_mat = jnp.transpose(weight, (2, 3, 1, 0)).reshape(KH * KW * Cin, Cout)
    w_mat = jnp.pad(w_mat.astype(jnp.float32),
                    ((0, KP - KH * KW * Cin), (0, CP - Cout)))      # (KP, CP)
    gb = jnp.stack([jnp.pad(gamma.astype(jnp.float32), (0, CP - Cout)),
                    jnp.pad(beta.astype(jnp.float32), (0, CP - Cout))], axis=0)  # (2, CP)

    kernel = functools.partial(fused_conv_bn_kernel,
                               oh_ow=(OH, OW), ks=(KH, KW), c_half=C, m=M)

    out = pl.pallas_call(
        kernel,
        out_shape=jax.ShapeDtypeStruct((MP, CP), jnp.float32),
        grid=(1,),
        in_specs=[
            pl.BlockSpec((H, W, C), lambda i: (0, 0, 0)),
            pl.BlockSpec((H, W, C), lambda i: (0, 0, 0)),
            pl.BlockSpec((KP, CP), lambda i: (0, 0)),
            pl.BlockSpec((2, CP), lambda i: (0, 0)),
        ],
        out_specs=pl.BlockSpec((MP, CP), lambda i: (0, 0)),
        scratch_shapes=[pltpu.VMEM((MP, KP), jnp.float32)],
        compiler_params=pltpu.CompilerParams(dimension_semantics=("arbitrary",)),
    )(x1_hwc, x2_hwc, w_mat, gb)

    # (MP, CP) -> valid (M, Cout) -> (OH, OW, Cout) -> NCHW (1, Cout, OH, OW)
    return out[:M, :Cout].reshape(OH, OW, Cout).transpose(2, 0, 1)[None]


def reference_forward(x1, x2, weight, gamma, beta):
    """Pure-JAX reference: cat -> conv (no bias; cancelled by BN) -> training BN."""
    s = jnp.concatenate([x1, x2], axis=1)
    y = jax.lax.conv_general_dilated(s, weight, window_strides=(1, 1), padding="VALID",
                                     dimension_numbers=("NCHW", "OIHW", "NCHW"))
    mean = jnp.mean(y, axis=(0, 2, 3), keepdims=True)
    var = jnp.mean((y - mean) ** 2, axis=(0, 2, 3), keepdims=True)   # biased
    yhat = (y - mean) * jax.lax.rsqrt(var + EPS)
    return yhat * gamma[None, :, None, None] + beta[None, :, None, None]


if __name__ == "__main__":
    key = jax.random.PRNGKey(0)
    k_x1, k_x2, k_w = jax.random.split(key, 3)

    # Inputs as in the reference file: (1, 3, 6, 6) each, uniform [0, 1).
    x1 = jax.random.uniform(k_x1, (1, 3, 6, 6), dtype=jnp.float32)
    x2 = jax.random.uniform(k_x2, (1, 3, 6, 6), dtype=jnp.float32)

    # Deterministic parameter init (conv bias omitted: no-op under training-mode BN).
    Cout, Cin_total, Ksz = 3, 6, 4
    weight = 0.05 * jax.random.normal(k_w, (Cout, Cin_total, Ksz, Ksz), dtype=jnp.float32)
    gamma = jnp.ones((Cout,), dtype=jnp.float32)    # BatchNorm2d default affine weight
    beta = jnp.zeros((Cout,), dtype=jnp.float32)    # BatchNorm2d default affine bias

    out = fused_forward(x1, x2, weight, gamma, beta)
    jax.block_until_ready(out)
    assert out.shape == (1, 3, 3, 3), out.shape
    assert bool(jnp.all(jnp.isfinite(out)))

    ref = reference_forward(x1, x2, weight, gamma, beta)
    assert bool(jnp.allclose(out, ref, atol=1e-4, rtol=1e-4)), "mismatch vs pure-JAX reference"

    print("KERNEL_OK")
</pallas_src>

<mosaic_0001>
module attributes {stable_mosaic.version = 11 : i64} {
  func.func @fused_conv_bn_kernel(%arg0: i32, %arg1: memref<6x6x3xf32, #tpu.memory_space<vmem>>, %arg2: memref<6x6x3xf32, #tpu.memory_space<vmem>>, %arg3: memref<128x128xf32, #tpu.memory_space<vmem>>, %arg4: memref<2x128xf32, #tpu.memory_space<vmem>>, %arg5: memref<16x128xf32, #tpu.memory_space<vmem>>, %arg6: memref<16x128xf32, #tpu.memory_space<vmem>>) attributes {dimension_semantics = [#tpu.dimension_semantics<arbitrary>], iteration_bounds = array<i64: 1>, scalar_prefetch = 0 : i64, scratch_operands = 1 : i64, tpu.core_type = #tpu.core_type<tc>, window_params = [{pipeline_mode = #tpu.pipeline_mode<synchronous>, transform_indices = @transform_0, window_bounds = array<i64: 6, 6, 3>}, {pipeline_mode = #tpu.pipeline_mode<synchronous>, transform_indices = @transform_1, window_bounds = array<i64: 6, 6, 3>}, {pipeline_mode = #tpu.pipeline_mode<synchronous>, transform_indices = @transform_2, window_bounds = array<i64: 128, 128>}, {pipeline_mode = #tpu.pipeline_mode<synchronous>, transform_indices = @transform_3, window_bounds = array<i64: 2, 128>}, {pipeline_mode = #tpu.pipeline_mode<synchronous>, transform_indices = @transform_4, window_bounds = array<i64: 16, 128>}]} {
    %cst = arith.constant 0.000000e+00 : f32
    %0 = vector.broadcast %cst : f32 to vector<16x128xf32>
    %c0 = arith.constant 0 : index
    %c0_0 = arith.constant 0 : index
    %1 = vector.load %arg6[%c0, %c0_0] : memref<16x128xf32, #tpu.memory_space<vmem>>, vector<16x128xf32>
    tpu.vector_store %arg6[%c0, %c0_0], %0 {strides = array<i32>} : memref<16x128xf32, #tpu.memory_space<vmem>>, vector<16x128xf32>,
    %c0_1 = arith.constant 0 : index
    %c0_2 = arith.constant 0 : index
    %c0_3 = arith.constant 0 : index
    %2 = vector.load %arg1[%c0_1, %c0_2, %c0_3] : memref<6x6x3xf32, #tpu.memory_space<vmem>>, vector<6x6x3xf32>
    %c0_4 = arith.constant 0 : index
    %c0_5 = arith.constant 0 : index
    %c0_6 = arith.constant 0 : index
    %3 = vector.load %arg2[%c0_4, %c0_5, %c0_6] : memref<6x6x3xf32, #tpu.memory_space<vmem>>, vector<6x6x3xf32>
    %4 = vector.extract_strided_slice %2 {offsets = [0, 0, 0], sizes = [1, 3, 3], strides = [1, 1, 1]} : vector<6x6x3xf32> to vector<1x3x3xf32>
    %5 = vector.shape_cast %4 : vector<1x3x3xf32> to vector<3x3xf32>
    %c0_7 = arith.constant 0 : index
    %c0_8 = arith.constant 0 : index
    %6 = vector.load %arg6[%c0_7, %c0_8] : memref<16x128xf32, #tpu.memory_space<vmem>>, vector<3x3xf32>
    tpu.vector_store %arg6[%c0_7, %c0_8], %5 {strides = array<i32>} : memref<16x128xf32, #tpu.memory_space<vmem>>, vector<3x3xf32>,
    %7 = vector.extract_strided_slice %3 {offsets = [0, 0, 0], sizes = [1, 3, 3], strides = [1, 1, 1]} : vector<6x6x3xf32> to vector<1x3x3xf32>
    %8 = vector.shape_cast %7 : vector<1x3x3xf32> to vector<3x3xf32>
    %c0_9 = arith.constant 0 : index
    %c3 = arith.constant 3 : index
    %9 = vector.load %arg6[%c0_9, %c3] : memref<16x128xf32, #tpu.memory_space<vmem>>, vector<3x3xf32>
    tpu.vector_store %arg6[%c0_9, %c3], %8 {strides = array<i32>} : memref<16x128xf32, #tpu.memory_space<vmem>>, vector<3x3xf32>,
    %10 = vector.extract_strided_slice %2 {offsets = [1, 0, 0], sizes = [1, 3, 3], strides = [1, 1, 1]} : vector<6x6x3xf32> to vector<1x3x3xf32>
    %11 = vector.shape_cast %10 : vector<1x3x3xf32> to vector<3x3xf32>
    %c3_10 = arith.constant 3 : index
    %c0_11 = arith.constant 0 : index
    %12 = vector.load %arg6[%c3_10, %c0_11] : memref<16x128xf32, #tpu.memory_space<vmem>>, vector<3x3xf32>
    tpu.vector_store %arg6[%c3_10, %c0_11], %11 {strides = array<i32>} : memref<16x128xf32, #tpu.memory_space<vmem>>, vector<3x3xf32>,
    %13 = vector.extract_strided_slice %3 {offsets = [1, 0, 0], sizes = [1, 3, 3], strides = [1, 1, 1]} : vector<6x6x3xf32> to vector<1x3x3xf32>
    %14 = vector.shape_cast %13 : vector<1x3x3xf32> to vector<3x3xf32>
    %c3_12 = arith.constant 3 : index
    %c3_13 = arith.constant 3 : index
    %15 = vector.load %arg6[%c3_12, %c3_13] : memref<16x128xf32, #tpu.memory_space<vmem>>, vector<3x3xf32>
    tpu.vector_store %arg6[%c3_12, %c3_13], %14 {strides = array<i32>} : memref<16x128xf32, #tpu.memory_space<vmem>>, vector<3x3xf32>,
    %16 = vector.extract_strided_slice %2 {offsets = [2, 0, 0], sizes = [1, 3, 3], strides = [1, 1, 1]} : vector<6x6x3xf32> to vector<1x3x3xf32>
    %17 = vector.shape_cast %16 : vector<1x3x3xf32> to vector<3x3xf32>
    %c6 = arith.constant 6 : index
    %c0_14 = arith.constant 0 : index
    %18 = vector.load %arg6[%c6, %c0_14] : memref<16x128xf32, #tpu.memory_space<vmem>>, vector<3x3xf32>
    tpu.vector_store %arg6[%c6, %c0_14], %17 {strides = array<i32>} : memref<16x128xf32, #tpu.memory_space<vmem>>, vector<3x3xf32>,
    %19 = vector.extract_strided_slice %3 {offsets = [2, 0, 0], sizes = [1, 3, 3], strides = [1, 1, 1]} : vector<6x6x3xf32> to vector<1x3x3xf32>
    %20 = vector.shape_cast %19 : vector<1x3x3xf32> to vector<3x3xf32>
    %c6_15 = arith.constant 6 : index
    %c3_16 = arith.constant 3 : index
    %21 = vector.load %arg6[%c6_15, %c3_16] : memref<16x128xf32, #tpu.memory_space<vmem>>, vector<3x3xf32>
    tpu.vector_store %arg6[%c6_15, %c3_16], %20 {strides = array<i32>} : memref<16x128xf32, #tpu.memory_space<vmem>>, vector<3x3xf32>,
    %22 = vector.extract_strided_slice %2 {offsets = [0, 1, 0], sizes = [1, 3, 3], strides = [1, 1, 1]} : vector<6x6x3xf32> to vector<1x3x3xf32>
    %23 = vector.shape_cast %22 : vector<1x3x3xf32> to vector<3x3xf32>
    %c0_17 = arith.constant 0 : index
    %c6_18 = arith.constant 6 : index
    %24 = vector.load %arg6[%c0_17, %c6_18] : memref<16x128xf32, #tpu.memory_space<vmem>>, vector<3x3xf32>
    tpu.vector_store %arg6[%c0_17, %c6_18], %23 {strides = array<i32>} : memref<16x128xf32, #tpu.memory_space<vmem>>, vector<3x3xf32>,
    %25 = vector.extract_strided_slice %3 {offsets = [0, 1, 0], sizes = [1, 3, 3], strides = [1, 1, 1]} : vector<6x6x3xf32> to vector<1x3x3xf32>
    %26 = vector.shape_cast %25 : vector<1x3x3xf32> to vector<3x3xf32>
    %c0_19 = arith.constant 0 : index
    %c9 = arith.constant 9 : index
    %27 = vector.load %arg6[%c0_19, %c9] : memref<16x128xf32, #tpu.memory_space<vmem>>, vector<3x3xf32>
    tpu.vector_store %arg6[%c0_19, %c9], %26 {strides = array<i32>} : memref<16x128xf32, #tpu.memory_space<vmem>>, vector<3x3xf32>,
    %28 = vector.extract_strided_slice %2 {offsets = [1, 1, 0], sizes = [1, 3, 3], strides = [1, 1, 1]} : vector<6x6x3xf32> to vector<1x3x3xf32>
    %29 = vector.shape_cast %28 : vector<1x3x3xf32> to vector<3x3xf32>
    %c3_20 = arith.constant 3 : index
    %c6_21 = arith.constant 6 : index
    %30 = vector.load %arg6[%c3_20, %c6_21] : memref<16x128xf32, #tpu.memory_space<vmem>>, vector<3x3xf32>
    tpu.vector_store %arg6[%c3_20, %c6_21], %29 {strides = array<i32>} : memref<16x128xf32, #tpu.memory_space<vmem>>, vector<3x3xf32>,
    %31 = vector.extract_strided_slice %3 {offsets = [1, 1, 0], sizes = [1, 3, 3], strides = [1, 1, 1]} : vector<6x6x3xf32> to vector<1x3x3xf32>
    %32 = vector.shape_cast %31 : vector<1x3x3xf32> to vector<3x3xf32>
    %c3_22 = arith.constant 3 : index
    %c9_23 = arith.constant 9 : index
    %33 = vector.load %arg6[%c3_22, %c9_23] : memref<16x128xf32, #tpu.memory_space<vmem>>, vector<3x3xf32>
    tpu.vector_store %arg6[%c3_22, %c9_23], %32 {strides = array<i32>} : memref<16x128xf32, #tpu.memory_space<vmem>>, vector<3x3xf32>,
    %34 = vector.extract_strided_slice %2 {offsets = [2, 1, 0], sizes = [1, 3, 3], strides = [1, 1, 1]} : vector<6x6x3xf32> to vector<1x3x3xf32>
    %35 = vector.shape_cast %34 : vector<1x3x3xf32> to vector<3x3xf32>
    %c6_24 = arith.constant 6 : index
    %c6_25 = arith.constant 6 : index
    %36 = vector.load %arg6[%c6_24, %c6_25] : memref<16x128xf32, #tpu.memory_space<vmem>>, vector<3x3xf32>
    tpu.vector_store %arg6[%c6_24, %c6_25], %35 {strides = array<i32>} : memref<16x128xf32, #tpu.memory_space<vmem>>, vector<3x3xf32>,
    %37 = vector.extract_strided_slice %3 {offsets = [2, 1, 0], sizes = [1, 3, 3], strides = [1, 1, 1]} : vector<6x6x3xf32> to vector<1x3x3xf32>
    %38 = vector.shape_cast %37 : vector<1x3x3xf32> to vector<3x3xf32>
    %c6_26 = arith.constant 6 : index
    %c9_27 = arith.constant 9 : index
    %39 = vector.load %arg6[%c6_26, %c9_27] : memref<16x128xf32, #tpu.memory_space<vmem>>, vector<3x3xf32>
    tpu.vector_store %arg6[%c6_26, %c9_27], %38 {strides = array<i32>} : memref<16x128xf32, #tpu.memory_space<vmem>>, vector<3x3xf32>,
    %40 = vector.extract_strided_slice %2 {offsets = [0, 2, 0], sizes = [1, 3, 3], strides = [1, 1, 1]} : vector<6x6x3xf32> to vector<1x3x3xf32>
    %41 = vector.shape_cast %40 : vector<1x3x3xf32> to vector<3x3xf32>
    %c0_28 = arith.constant 0 : index
    %c12 = arith.constant 12 : index
    %42 = vector.load %arg6[%c0_28, %c12] : memref<16x128xf32, #tpu.memory_space<vmem>>, vector<3x3xf32>
    tpu.vector_store %arg6[%c0_28, %c12], %41 {strides = array<i32>} : memref<16x128xf32, #tpu.memory_space<vmem>>, vector<3x3xf32>,
    %43 = vector.extract_strided_slice %3 {offsets = [0, 2, 0], sizes = [1, 3, 3], strides = [1, 1, 1]} : vector<6x6x3xf32> to vector<1x3x3xf32>
    %44 = vector.shape_cast %43 : vector<1x3x3xf32> to vector<3x3xf32>
    %c0_29 = arith.constant 0 : index
    %c15 = arith.constant 15 : index
    %45 = vector.load %arg6[%c0_29, %c15] : memref<16x128xf32, #tpu.memory_space<vmem>>, vector<3x3xf32>
    tpu.vector_store %arg6[%c0_29, %c15], %44 {strides = array<i32>} : memref<16x128xf32, #tpu.memory_space<vmem>>, vector<3x3xf32>,
    %46 = vector.extract_strided_slice %2 {offsets = [1, 2, 0], sizes = [1, 3, 3], strides = [1, 1, 1]} : vector<6x6x3xf32> to vector<1x3x3xf32>
    %47 = vector.shape_cast %46 : vector<1x3x3xf32> to vector<3x3xf32>
    %c3_30 = arith.constant 3 : index
    %c12_31 = arith.constant 12 : index
    %48 = vector.load %arg6[%c3_30, %c12_31] : memref<16x128xf32, #tpu.memory_space<vmem>>, vector<3x3xf32>
    tpu.vector_store %arg6[%c3_30, %c12_31], %47 {strides = array<i32>} : memref<16x128xf32, #tpu.memory_space<vmem>>, vector<3x3xf32>,
    %49 = vector.extract_strided_slice %3 {offsets = [1, 2, 0], sizes = [1, 3, 3], strides = [1, 1, 1]} : vector<6x6x3xf32> to vector<1x3x3xf32>
    %50 = vector.shape_cast %49 : vector<1x3x3xf32> to vector<3x3xf32>
    %c3_32 = arith.constant 3 : index
    %c15_33 = arith.constant 15 : index
    %51 = vector.load %arg6[%c3_32, %c15_33] : memref<16x128xf32, #tpu.memory_space<vmem>>, vector<3x3xf32>
    tpu.vector_store %arg6[%c3_32, %c15_33], %50 {strides = array<i32>} : memref<16x128xf32, #tpu.memory_space<vmem>>, vector<3x3xf32>,
    %52 = vector.extract_strided_slice %2 {offsets = [2, 2, 0], sizes = [1, 3, 3], strides = [1, 1, 1]} : vector<6x6x3xf32> to vector<1x3x3xf32>
    %53 = vector.shape_cast %52 : vector<1x3x3xf32> to vector<3x3xf32>
    %c6_34 = arith.constant 6 : index
    %c12_35 = arith.constant 12 : index
    %54 = vector.load %arg6[%c6_34, %c12_35] : memref<16x128xf32, #tpu.memory_space<vmem>>, vector<3x3xf32>
    tpu.vector_store %arg6[%c6_34, %c12_35], %53 {strides = array<i32>} : memref<16x128xf32, #tpu.memory_space<vmem>>, vector<3x3xf32>,
    %55 = vector.extract_strided_slice %3 {offsets = [2, 2, 0], sizes = [1, 3, 3], strides = [1, 1, 1]} : vector<6x6x3xf32> to vector<1x3x3xf32>
    %56 = vector.shape_cast %55 : vector<1x3x3xf32> to vector<3x3xf32>
    %c6_36 = arith.constant 6 : index
    %c15_37 = arith.constant 15 : index
    %57 = vector.load %arg6[%c6_36, %c15_37] : memref<16x128xf32, #tpu.memory_space<vmem>>, vector<3x3xf32>
    tpu.vector_store %arg6[%c6_36, %c15_37], %56 {strides = array<i32>} : memref<16x128xf32, #tpu.memory_space<vmem>>, vector<3x3xf32>,
    %58 = vector.extract_strided_slice %2 {offsets = [0, 3, 0], sizes = [1, 3, 3], strides = [1, 1, 1]} : vector<6x6x3xf32> to vector<1x3x3xf32>
    %59 = vector.shape_cast %58 : vector<1x3x3xf32> to vector<3x3xf32>
    %c0_38 = arith.constant 0 : index
    %c18 = arith.constant 18 : index
    %60 = vector.load %arg6[%c0_38, %c18] : memref<16x128xf32, #tpu.memory_space<vmem>>, vector<3x3xf32>
    tpu.vector_store %arg6[%c0_38, %c18], %59 {strides = array<i32>} : memref<16x128xf32, #tpu.memory_space<vmem>>, vector<3x3xf32>,
    %61 = vector.extract_strided_slice %3 {offsets = [0, 3, 0], sizes = [1, 3, 3], strides = [1, 1, 1]} : vector<6x6x3xf32> to vector<1x3x3xf32>
    %62 = vector.shape_cast %61 : vector<1x3x3xf32> to vector<3x3xf32>
    %c0_39 = arith.constant 0 : index
    %c21 = arith.constant 21 : index
    %63 = vector.load %arg6[%c0_39, %c21] : memref<16x128xf32, #tpu.memory_space<vmem>>, vector<3x3xf32>
    tpu.vector_store %arg6[%c0_39, %c21], %62 {strides = array<i32>} : memref<16x128xf32, #tpu.memory_space<vmem>>, vector<3x3xf32>,
    %64 = vector.extract_strided_slice %2 {offsets = [1, 3, 0], sizes = [1, 3, 3], strides = [1, 1, 1]} : vector<6x6x3xf32> to vector<1x3x3xf32>
    %65 = vector.shape_cast %64 : vector<1x3x3xf32> to vector<3x3xf32>
    %c3_40 = arith.constant 3 : index
    %c18_41 = arith.constant 18 : index
    %66 = vector.load %arg6[%c3_40, %c18_41] : memref<16x128xf32, #tpu.memory_space<vmem>>, vector<3x3xf32>
    tpu.vector_store %arg6[%c3_40, %c18_41], %65 {strides = array<i32>} : memref<16x128xf32, #tpu.memory_space<vmem>>, vector<3x3xf32>,
    %67 = vector.extract_strided_slice %3 {offsets = [1, 3, 0], sizes = [1, 3, 3], strides = [1, 1, 1]} : vector<6x6x3xf32> to vector<1x3x3xf32>
    %68 = vector.shape_cast %67 : vector<1x3x3xf32> to vector<3x3xf32>
    %c3_42 = arith.constant 3 : index
    %c21_43 = arith.constant 21 : index
    %69 = vector.load %arg6[%c3_42, %c21_43] : memref<16x128xf32, #tpu.memory_space<vmem>>, vector<3x3xf32>
    tpu.vector_store %arg6[%c3_42, %c21_43], %68 {strides = array<i32>} : memref<16x128xf32, #tpu.memory_space<vmem>>, vector<3x3xf32>,
    %70 = vector.extract_strided_slice %2 {offsets = [2, 3, 0], sizes = [1, 3, 3], strides = [1, 1, 1]} : vector<6x6x3xf32> to vector<1x3x3xf32>
    %71 = vector.shape_cast %70 : vector<1x3x3xf32> to vector<3x3xf32>
    %c6_44 = arith.constant 6 : index
    %c18_45 = arith.constant 18 : index
    %72 = vector.load %arg6[%c6_44, %c18_45] : memref<16x128xf32, #tpu.memory_space<vmem>>, vector<3x3xf32>
    tpu.vector_store %arg6[%c6_44, %c18_45], %71 {strides = array<i32>} : memref<16x128xf32, #tpu.memory_space<vmem>>, vector<3x3xf32>,
    %73 = vector.extract_strided_slice %3 {offsets = [2, 3, 0], sizes = [1, 3, 3], strides = [1, 1, 1]} : vector<6x6x3xf32> to vector<1x3x3xf32>
    %74 = vector.shape_cast %73 : vector<1x3x3xf32> to vector<3x3xf32>
    %c6_46 = arith.constant 6 : index
    %c21_47 = arith.constant 21 : index
    %75 = vector.load %arg6[%c6_46, %c21_47] : memref<16x128xf32, #tpu.memory_space<vmem>>, vector<3x3xf32>
    tpu.vector_store %arg6[%c6_46, %c21_47], %74 {strides = array<i32>} : memref<16x128xf32, #tpu.memory_space<vmem>>, vector<3x3xf32>,
    %76 = vector.extract_strided_slice %2 {offsets = [1, 0, 0], sizes = [1, 3, 3], strides = [1, 1, 1]} : vector<6x6x3xf32> to vector<1x3x3xf32>
    %77 = vector.shape_cast %76 : vector<1x3x3xf32> to vector<3x3xf32>
    %c0_48 = arith.constant 0 : index
    %c24 = arith.constant 24 : index
    %78 = vector.load %arg6[%c0_48, %c24] : memref<16x128xf32, #tpu.memory_space<vmem>>, vector<3x3xf32>
    tpu.vector_store %arg6[%c0_48, %c24], %77 {strides = array<i32>} : memref<16x128xf32, #tpu.memory_space<vmem>>, vector<3x3xf32>,
    %79 = vector.extract_strided_slice %3 {offsets = [1, 0, 0], sizes = [1, 3, 3], strides = [1, 1, 1]} : vector<6x6x3xf32> to vector<1x3x3xf32>
    %80 = vector.shape_cast %79 : vector<1x3x3xf32> to vector<3x3xf32>
    %c0_49 = arith.constant 0 : index
    %c27 = arith.constant 27 : index
    %81 = vector.load %arg6[%c0_49, %c27] : memref<16x128xf32, #tpu.memory_space<vmem>>, vector<3x3xf32>
    tpu.vector_store %arg6[%c0_49, %c27], %80 {strides = array<i32>} : memref<16x128xf32, #tpu.memory_space<vmem>>, vector<3x3xf32>,
    %82 = vector.extract_strided_slice %2 {offsets = [2, 0, 0], sizes = [1, 3, 3], strides = [1, 1, 1]} : vector<6x6x3xf32> to vector<1x3x3xf32>
    %83 = vector.shape_cast %82 : vector<1x3x3xf32> to vector<3x3xf32>
    %c3_50 = arith.constant 3 : index
    %c24_51 = arith.constant 24 : index
    %84 = vector.load %arg6[%c3_50, %c24_51] : memref<16x128xf32, #tpu.memory_space<vmem>>, vector<3x3xf32>
    tpu.vector_store %arg6[%c3_50, %c24_51], %83 {strides = array<i32>} : memref<16x128xf32, #tpu.memory_space<vmem>>, vector<3x3xf32>,
    %85 = vector.extract_strided_slice %3 {offsets = [2, 0, 0], sizes = [1, 3, 3], strides = [1, 1, 1]} : vector<6x6x3xf32> to vector<1x3x3xf32>
    %86 = vector.shape_cast %85 : vector<1x3x3xf32> to vector<3x3xf32>
    %c3_52 = arith.constant 3 : index
    %c27_53 = arith.constant 27 : index
    %87 = vector.load %arg6[%c3_52, %c27_53] : memref<16x128xf32, #tpu.memory_space<vmem>>, vector<3x3xf32>
    tpu.vector_store %arg6[%c3_52, %c27_53], %86 {strides = array<i32>} : memref<16x128xf32, #tpu.memory_space<vmem>>, vector<3x3xf32>,
    %88 = vector.extract_strided_slice %2 {offsets = [3, 0, 0], sizes = [1, 3, 3], strides = [1, 1, 1]} : vector<6x6x3xf32> to vector<1x3x3xf32>
    %89 = vector.shape_cast %88 : vector<1x3x3xf32> to vector<3x3xf32>
    %c6_54 = arith.constant 6 : index
    %c24_55 = arith.constant 24 : index
    %90 = vector.load %arg6[%c6_54, %c24_55] : memref<16x128xf32, #tpu.memory_space<vmem>>, vector<3x3xf32>
    tpu.vector_store %arg6[%c6_54, %c24_55], %89 {strides = array<i32>} : memref<16x128xf32, #tpu.memory_space<vmem>>, vector<3x3xf32>,
    %91 = vector.extract_strided_slice %3 {offsets = [3, 0, 0], sizes = [1, 3, 3], strides = [1, 1, 1]} : vector<6x6x3xf32> to vector<1x3x3xf32>
    %92 = vector.shape_cast %91 : vector<1x3x3xf32> to vector<3x3xf32>
    %c6_56 = arith.constant 6 : index
    %c27_57 = arith.constant 27 : index
    %93 = vector.load %arg6[%c6_56, %c27_57] : memref<16x128xf32, #tpu.memory_space<vmem>>, vector<3x3xf32>
    tpu.vector_store %arg6[%c6_56, %c27_57], %92 {strides = array<i32>} : memref<16x128xf32, #tpu.memory_space<vmem>>, vector<3x3xf32>,
    %94 = vector.extract_strided_slice %2 {offsets = [1, 1, 0], sizes = [1, 3, 3], strides = [1, 1, 1]} : vector<6x6x3xf32> to vector<1x3x3xf32>
    %95 = vector.shape_cast %94 : vector<1x3x3xf32> to vector<3x3xf32>
    %c0_58 = arith.constant 0 : index
    %c30 = arith.constant 30 : index
    %96 = vector.load %arg6[%c0_58, %c30] : memref<16x128xf32, #tpu.memory_space<vmem>>, vector<3x3xf32>
    tpu.vector_store %arg6[%c0_58, %c30], %95 {strides = array<i32>} : memref<16x128xf32, #tpu.memory_space<vmem>>, vector<3x3xf32>,
    %97 = vector.extract_strided_slice %3 {offsets = [1, 1, 0], sizes = [1, 3, 3], strides = [1, 1, 1]} : vector<6x6x3xf32> to vector<1x3x3xf32>
    %98 = vector.shape_cast %97 : vector<1x3x3xf32> to vector<3x3xf32>
    %c0_59 = arith.constant 0 : index
    %c33 = arith.constant 33 : index
    %99 = vector.load %arg6[%c0_59, %c33] : memref<16x128xf32, #tpu.memory_space<vmem>>, vector<3x3xf32>
    tpu.vector_store %arg6[%c0_59, %c33], %98 {strides = array<i32>} : memref<16x128xf32, #tpu.memory_space<vmem>>, vector<3x3xf32>,
    %100 = vector.extract_strided_slice %2 {offsets = [2, 1, 0], sizes = [1, 3, 3], strides = [1, 1, 1]} : vector<6x6x3xf32> to vector<1x3x3xf32>
    %101 = vector.shape_cast %100 : vector<1x3x3xf32> to vector<3x3xf32>
    %c3_60 = arith.constant 3 : index
    %c30_61 = arith.constant 30 : index
    %102 = vector.load %arg6[%c3_60, %c30_61] : memref<16x128xf32, #tpu.memory_space<vmem>>, vector<3x3xf32>
    tpu.vector_store %arg6[%c3_60, %c30_61], %101 {strides = array<i32>} : memref<16x128xf32, #tpu.memory_space<vmem>>, vector<3x3xf32>,
    %103 = vector.extract_strided_slice %3 {offsets = [2, 1, 0], sizes = [1, 3, 3], strides = [1, 1, 1]} : vector<6x6x3xf32> to vector<1x3x3xf32>
    %104 = vector.shape_cast %103 : vector<1x3x3xf32> to vector<3x3xf32>
    %c3_62 = arith.constant 3 : index
    %c33_63 = arith.constant 33 : index
    %105 = vector.load %arg6[%c3_62, %c33_63] : memref<16x128xf32, #tpu.memory_space<vmem>>, vector<3x3xf32>
    tpu.vector_store %arg6[%c3_62, %c33_63], %104 {strides = array<i32>} : memref<16x128xf32, #tpu.memory_space<vmem>>, vector<3x3xf32>,
    %106 = vector.extract_strided_slice %2 {offsets = [3, 1, 0], sizes = [1, 3, 3], strides = [1, 1, 1]} : vector<6x6x3xf32> to vector<1x3x3xf32>
    %107 = vector.shape_cast %106 : vector<1x3x3xf32> to vector<3x3xf32>
    %c6_64 = arith.constant 6 : index
    %c30_65 = arith.constant 30 : index
    %108 = vector.load %arg6[%c6_64, %c30_65] : memref<16x128xf32, #tpu.memory_space<vmem>>, vector<3x3xf32>
    tpu.vector_store %arg6[%c6_64, %c30_65], %107 {strides = array<i32>} : memref<16x128xf32, #tpu.memory_space<vmem>>, vector<3x3xf32>,
    %109 = vector.extract_strided_slice %3 {offsets = [3, 1, 0], sizes = [1, 3, 3], strides = [1, 1, 1]} : vector<6x6x3xf32> to vector<1x3x3xf32>
    %110 = vector.shape_cast %109 : vector<1x3x3xf32> to vector<3x3xf32>
    %c6_66 = arith.constant 6 : index
    %c33_67 = arith.constant 33 : index
    %111 = vector.load %arg6[%c6_66, %c33_67] : memref<16x128xf32, #tpu.memory_space<vmem>>, vector<3x3xf32>
    tpu.vector_store %arg6[%c6_66, %c33_67], %110 {strides = array<i32>} : memref<16x128xf32, #tpu.memory_space<vmem>>, vector<3x3xf32>,
    %112 = vector.extract_strided_slice %2 {offsets = [1, 2, 0], sizes = [1, 3, 3], strides = [1, 1, 1]} : vector<6x6x3xf32> to vector<1x3x3xf32>
    %113 = vector.shape_cast %112 : vector<1x3x3xf32> to vector<3x3xf32>
    %c0_68 = arith.constant 0 : index
    %c36 = arith.constant 36 : index
    %114 = vector.load %arg6[%c0_68, %c36] : memref<16x128xf32, #tpu.memory_space<vmem>>, vector<3x3xf32>
    tpu.vector_store %arg6[%c0_68, %c36], %113 {strides = array<i32>} : memref<16x128xf32, #tpu.memory_space<vmem>>, vector<3x3xf32>,
    %115 = vector.extract_strided_slice %3 {offsets = [1, 2, 0], sizes = [1, 3, 3], strides = [1, 1, 1]} : vector<6x6x3xf32> to vector<1x3x3xf32>
    %116 = vector.shape_cast %115 : vector<1x3x3xf32> to vector<3x3xf32>
    %c0_69 = arith.constant 0 : index
    %c39 = arith.constant 39 : index
    %117 = vector.load %arg6[%c0_69, %c39] : memref<16x128xf32, #tpu.memory_space<vmem>>, vector<3x3xf32>
    tpu.vector_store %arg6[%c0_69, %c39], %116 {strides = array<i32>} : memref<16x128xf32, #tpu.memory_space<vmem>>, vector<3x3xf32>,
    %118 = vector.extract_strided_slice %2 {offsets = [2, 2, 0], sizes = [1, 3, 3], strides = [1, 1, 1]} : vector<6x6x3xf32> to vector<1x3x3xf32>
    %119 = vector.shape_cast %118 : vector<1x3x3xf32> to vector<3x3xf32>
    %c3_70 = arith.constant 3 : index
    %c36_71 = arith.constant 36 : index
    %120 = vector.load %arg6[%c3_70, %c36_71] : memref<16x128xf32, #tpu.memory_space<vmem>>, vector<3x3xf32>
    tpu.vector_store %arg6[%c3_70, %c36_71], %119 {strides = array<i32>} : memref<16x128xf32, #tpu.memory_space<vmem>>, vector<3x3xf32>,
    %121 = vector.extract_strided_slice %3 {offsets = [2, 2, 0], sizes = [1, 3, 3], strides = [1, 1, 1]} : vector<6x6x3xf32> to vector<1x3x3xf32>
    %122 = vector.shape_cast %121 : vector<1x3x3xf32> to vector<3x3xf32>
    %c3_72 = arith.constant 3 : index
    %c39_73 = arith.constant 39 : index
    %123 = vector.load %arg6[%c3_72, %c39_73] : memref<16x128xf32, #tpu.memory_space<vmem>>, vector<3x3xf32>
    tpu.vector_store %arg6[%c3_72, %c39_73], %122 {strides = array<i32>} : memref<16x128xf32, #tpu.memory_space<vmem>>, vector<3x3xf32>,
    %124 = vector.extract_strided_slice %2 {offsets = [3, 2, 0], sizes = [1, 3, 3], strides = [1, 1, 1]} : vector<6x6x3xf32> to vector<1x3x3xf32>
    %125 = vector.shape_cast %124 : vector<1x3x3xf32> to vector<3x3xf32>
    %c6_74 = arith.constant 6 : index
    %c36_75 = arith.constant 36 : index
    %126 = vector.load %arg6[%c6_74, %c36_75] : memref<16x128xf32, #tpu.memory_space<vmem>>, vector<3x3xf32>
    tpu.vector_store %arg6[%c6_74, %c36_75], %125 {strides = array<i32>} : memref<16x128xf32, #tpu.memory_space<vmem>>, vector<3x3xf32>,
    %127 = vector.extract_strided_slice %3 {offsets = [3, 2, 0], sizes = [1, 3, 3], strides = [1, 1, 1]} : vector<6x6x3xf32> to vector<1x3x3xf32>
    %128 = vector.shape_cast %127 : vector<1x3x3xf32> to vector<3x3xf32>
    %c6_76 = arith.constant 6 : index
    %c39_77 = arith.constant 39 : index
    %129 = vector.load %arg6[%c6_76, %c39_77] : memref<16x128xf32, #tpu.memory_space<vmem>>, vector<3x3xf32>
    tpu.vector_store %arg6[%c6_76, %c39_77], %128 {strides = array<i32>} : memref<16x128xf32, #tpu.memory_space<vmem>>, vector<3x3xf32>,
    %130 = vector.extract_strided_slice %2 {offsets = [1, 3, 0], sizes = [1, 3, 3], strides = [1, 1, 1]} : vector<6x6x3xf32> to vector<1x3x3xf32>
    %131 = vector.shape_cast %130 : vector<1x3x3xf32> to vector<3x3xf32>
    %c0_78 = arith.constant 0 : index
    %c42 = arith.constant 42 : index
    %132 = vector.load %arg6[%c0_78, %c42] : memref<16x128xf32, #tpu.memory_space<vmem>>, vector<3x3xf32>
    tpu.vector_store %arg6[%c0_78, %c42], %131 {strides = array<i32>} : memref<16x128xf32, #tpu.memory_space<vmem>>, vector<3x3xf32>,
    %133 = vector.extract_strided_slice %3 {offsets = [1, 3, 0], sizes = [1, 3, 3], strides = [1, 1, 1]} : vector<6x6x3xf32> to vector<1x3x3xf32>
    %134 = vector.shape_cast %133 : vector<1x3x3xf32> to vector<3x3xf32>
    %c0_79 = arith.constant 0 : index
    %c45 = arith.constant 45 : index
    %135 = vector.load %arg6[%c0_79, %c45] : memref<16x128xf32, #tpu.memory_space<vmem>>, vector<3x3xf32>
    tpu.vector_store %arg6[%c0_79, %c45], %134 {strides = array<i32>} : memref<16x128xf32, #tpu.memory_space<vmem>>, vector<3x3xf32>,
    %136 = vector.extract_strided_slice %2 {offsets = [2, 3, 0], sizes = [1, 3, 3], strides = [1, 1, 1]} : vector<6x6x3xf32> to vector<1x3x3xf32>
    %137 = vector.shape_cast %136 : vector<1x3x3xf32> to vector<3x3xf32>
    %c3_80 = arith.constant 3 : index
    %c42_81 = arith.constant 42 : index
    %138 = vector.load %arg6[%c3_80, %c42_81] : memref<16x128xf32, #tpu.memory_space<vmem>>, vector<3x3xf32>
    tpu.vector_store %arg6[%c3_80, %c42_81], %137 {strides = array<i32>} : memref<16x128xf32, #tpu.memory_space<vmem>>, vector<3x3xf32>,
    %139 = vector.extract_strided_slice %3 {offsets = [2, 3, 0], sizes = [1, 3, 3], strides = [1, 1, 1]} : vector<6x6x3xf32> to vector<1x3x3xf32>
    %140 = vector.shape_cast %139 : vector<1x3x3xf32> to vector<3x3xf32>
    %c3_82 = arith.constant 3 : index
    %c45_83 = arith.constant 45 : index
    %141 = vector.load %arg6[%c3_82, %c45_83] : memref<16x128xf32, #tpu.memory_space<vmem>>, vector<3x3xf32>
    tpu.vector_store %arg6[%c3_82, %c45_83], %140 {strides = array<i32>} : memref<16x128xf32, #tpu.memory_space<vmem>>, vector<3x3xf32>,
    %142 = vector.extract_strided_slice %2 {offsets = [3, 3, 0], sizes = [1, 3, 3], strides = [1, 1, 1]} : vector<6x6x3xf32> to vector<1x3x3xf32>
    %143 = vector.shape_cast %142 : vector<1x3x3xf32> to vector<3x3xf32>
    %c6_84 = arith.constant 6 : index
    %c42_85 = arith.constant 42 : index
    %144 = vector.load %arg6[%c6_84, %c42_85] : memref<16x128xf32, #tpu.memory_space<vmem>>, vector<3x3xf32>
    tpu.vector_store %arg6[%c6_84, %c42_85], %143 {strides = array<i32>} : memref<16x128xf32, #tpu.memory_space<vmem>>, vector<3x3xf32>,
    %145 = vector.extract_strided_slice %3 {offsets = [3, 3, 0], sizes = [1, 3, 3], strides = [1, 1, 1]} : vector<6x6x3xf32> to vector<1x3x3xf32>
    %146 = vector.shape_cast %145 : vector<1x3x3xf32> to vector<3x3xf32>
    %c6_86 = arith.constant 6 : index
    %c45_87 = arith.constant 45 : index
    %147 = vector.load %arg6[%c6_86, %c45_87] : memref<16x128xf32, #tpu.memory_space<vmem>>, vector<3x3xf32>
    tpu.vector_store %arg6[%c6_86, %c45_87], %146 {strides = array<i32>} : memref<16x128xf32, #tpu.memory_space<vmem>>, vector<3x3xf32>,
    %148 = vector.extract_strided_slice %2 {offsets = [2, 0, 0], sizes = [1, 3, 3], strides = [1, 1, 1]} : vector<6x6x3xf32> to vector<1x3x3xf32>
    %149 = vector.shape_cast %148 : vector<1x3x3xf32> to vector<3x3xf32>
    %c0_88 = arith.constant 0 : index
    %c48 = arith.constant 48 : index
    %150 = vector.load %arg6[%c0_88, %c48] : memref<16x128xf32, #tpu.memory_space<vmem>>, vector<3x3xf32>
    tpu.vector_store %arg6[%c0_88, %c48], %149 {strides = array<i32>} : memref<16x128xf32, #tpu.memory_space<vmem>>, vector<3x3xf32>,
    %151 = vector.extract_strided_slice %3 {offsets = [2, 0, 0], sizes = [1, 3, 3], strides = [1, 1, 1]} : vector<6x6x3xf32> to vector<1x3x3xf32>
    %152 = vector.shape_cast %151 : vector<1x3x3xf32> to vector<3x3xf32>
    %c0_89 = arith.constant 0 : index
    %c51 = arith.constant 51 : index
    %153 = vector.load %arg6[%c0_89, %c51] : memref<16x128xf32, #tpu.memory_space<vmem>>, vector<3x3xf32>
    tpu.vector_store %arg6[%c0_89, %c51], %152 {strides = array<i32>} : memref<16x128xf32, #tpu.memory_space<vmem>>, vector<3x3xf32>,
    %154 = vector.extract_strided_slice %2 {offsets = [3, 0, 0], sizes = [1, 3, 3], strides = [1, 1, 1]} : vector<6x6x3xf32> to vector<1x3x3xf32>
    %155 = vector.shape_cast %154 : vector<1x3x3xf32> to vector<3x3xf32>
    %c3_90 = arith.constant 3 : index
    %c48_91 = arith.constant 48 : index
    %156 = vector.load %arg6[%c3_90, %c48_91] : memref<16x128xf32, #tpu.memory_space<vmem>>, vector<3x3xf32>
    tpu.vector_store %arg6[%c3_90, %c48_91], %155 {strides = array<i32>} : memref<16x128xf32, #tpu.memory_space<vmem>>, vector<3x3xf32>,
    %157 = vector.extract_strided_slice %3 {offsets = [3, 0, 0], sizes = [1, 3, 3], strides = [1, 1, 1]} : vector<6x6x3xf32> to vector<1x3x3xf32>
    %158 = vector.shape_cast %157 : vector<1x3x3xf32> to vector<3x3xf32>
    %c3_92 = arith.constant 3 : index
    %c51_93 = arith.constant 51 : index
    %159 = vector.load %arg6[%c3_92, %c51_93] : memref<16x128xf32, #tpu.memory_space<vmem>>, vector<3x3xf32>
    tpu.vector_store %arg6[%c3_92, %c51_93], %158 {strides = array<i32>} : memref<16x128xf32, #tpu.memory_space<vmem>>, vector<3x3xf32>,
    %160 = vector.extract_strided_slice %2 {offsets = [4, 0, 0], sizes = [1, 3, 3], strides = [1, 1, 1]} : vector<6x6x3xf32> to vector<1x3x3xf32>
    %161 = vector.shape_cast %160 : vector<1x3x3xf32> to vector<3x3xf32>
    %c6_94 = arith.constant 6 : index
    %c48_95 = arith.constant 48 : index
    %162 = vector.load %arg6[%c6_94, %c48_95] : memref<16x128xf32, #tpu.memory_space<vmem>>, vector<3x3xf32>
    tpu.vector_store %arg6[%c6_94, %c48_95], %161 {strides = array<i32>} : memref<16x128xf32, #tpu.memory_space<vmem>>, vector<3x3xf32>,
    %163 = vector.extract_strided_slice %3 {offsets = [4, 0, 0], sizes = [1, 3, 3], strides = [1, 1, 1]} : vector<6x6x3xf32> to vector<1x3x3xf32>
    %164 = vector.shape_cast %163 : vector<1x3x3xf32> to vector<3x3xf32>
    %c6_96 = arith.constant 6 : index
    %c51_97 = arith.constant 51 : index
    %165 = vector.load %arg6[%c6_96, %c51_97] : memref<16x128xf32, #tpu.memory_space<vmem>>, vector<3x3xf32>
    tpu.vector_store %arg6[%c6_96, %c51_97], %164 {strides = array<i32>} : memref<16x128xf32, #tpu.memory_space<vmem>>, vector<3x3xf32>,
    %166 = vector.extract_strided_slice %2 {offsets = [2, 1, 0], sizes = [1, 3, 3], strides = [1, 1, 1]} : vector<6x6x3xf32> to vector<1x3x3xf32>
    %167 = vector.shape_cast %166 : vector<1x3x3xf32> to vector<3x3xf32>
    %c0_98 = arith.constant 0 : index
    %c54 = arith.constant 54 : index
    %168 = vector.load %arg6[%c0_98, %c54] : memref<16x128xf32, #tpu.memory_space<vmem>>, vector<3x3xf32>
    tpu.vector_store %arg6[%c0_98, %c54], %167 {strides = array<i32>} : memref<16x128xf32, #tpu.memory_space<vmem>>, vector<3x3xf32>,
    %169 = vector.extract_strided_slice %3 {offsets = [2, 1, 0], sizes = [1, 3, 3], strides = [1, 1, 1]} : vector<6x6x3xf32> to vector<1x3x3xf32>
    %170 = vector.shape_cast %169 : vector<1x3x3xf32> to vector<3x3xf32>
    %c0_99 = arith.constant 0 : index
    %c57 = arith.constant 57 : index
    %171 = vector.load %arg6[%c0_99, %c57] : memref<16x128xf32, #tpu.memory_space<vmem>>, vector<3x3xf32>
    tpu.vector_store %arg6[%c0_99, %c57], %170 {strides = array<i32>} : memref<16x128xf32, #tpu.memory_space<vmem>>, vector<3x3xf32>,
    %172 = vector.extract_strided_slice %2 {offsets = [3, 1, 0], sizes = [1, 3, 3], strides = [1, 1, 1]} : vector<6x6x3xf32> to vector<1x3x3xf32>
    %173 = vector.shape_cast %172 : vector<1x3x3xf32> to vector<3x3xf32>
    %c3_100 = arith.constant 3 : index
    %c54_101 = arith.constant 54 : index
    %174 = vector.load %arg6[%c3_100, %c54_101] : memref<16x128xf32, #tpu.memory_space<vmem>>, vector<3x3xf32>
    tpu.vector_store %arg6[%c3_100, %c54_101], %173 {strides = array<i32>} : memref<16x128xf32, #tpu.memory_space<vmem>>, vector<3x3xf32>,
    %175 = vector.extract_strided_slice %3 {offsets = [3, 1, 0], sizes = [1, 3, 3], strides = [1, 1, 1]} : vector<6x6x3xf32> to vector<1x3x3xf32>
    %176 = vector.shape_cast %175 : vector<1x3x3xf32> to vector<3x3xf32>
    %c3_102 = arith.constant 3 : index
    %c57_103 = arith.constant 57 : index
    %177 = vector.load %arg6[%c3_102, %c57_103] : memref<16x128xf32, #tpu.memory_space<vmem>>, vector<3x3xf32>
    tpu.vector_store %arg6[%c3_102, %c57_103], %176 {strides = array<i32>} : memref<16x128xf32, #tpu.memory_space<vmem>>, vector<3x3xf32>,
    %178 = vector.extract_strided_slice %2 {offsets = [4, 1, 0], sizes = [1, 3, 3], strides = [1, 1, 1]} : vector<6x6x3xf32> to vector<1x3x3xf32>
    %179 = vector.shape_cast %178 : vector<1x3x3xf32> to vector<3x3xf32>
    %c6_104 = arith.constant 6 : index
    %c54_105 = arith.constant 54 : index
    %180 = vector.load %arg6[%c6_104, %c54_105] : memref<16x128xf32, #tpu.memory_space<vmem>>, vector<3x3xf32>
    tpu.vector_store %arg6[%c6_104, %c54_105], %179 {strides = array<i32>} : memref<16x128xf32, #tpu.memory_space<vmem>>, vector<3x3xf32>,
    %181 = vector.extract_strided_slice %3 {offsets = [4, 1, 0], sizes = [1, 3, 3], strides = [1, 1, 1]} : vector<6x6x3xf32> to vector<1x3x3xf32>
    %182 = vector.shape_cast %181 : vector<1x3x3xf32> to vector<3x3xf32>
    %c6_106 = arith.constant 6 : index
    %c57_107 = arith.constant 57 : index
    %183 = vector.load %arg6[%c6_106, %c57_107] : memref<16x128xf32, #tpu.memory_space<vmem>>, vector<3x3xf32>
    tpu.vector_store %arg6[%c6_106, %c57_107], %182 {strides = array<i32>} : memref<16x128xf32, #tpu.memory_space<vmem>>, vector<3x3xf32>,
    %184 = vector.extract_strided_slice %2 {offsets = [2, 2, 0], sizes = [1, 3, 3], strides = [1, 1, 1]} : vector<6x6x3xf32> to vector<1x3x3xf32>
    %185 = vector.shape_cast %184 : vector<1x3x3xf32> to vector<3x3xf32>
    %c0_108 = arith.constant 0 : index
    %c60 = arith.constant 60 : index
    %186 = vector.load %arg6[%c0_108, %c60] : memref<16x128xf32, #tpu.memory_space<vmem>>, vector<3x3xf32>
    tpu.vector_store %arg6[%c0_108, %c60], %185 {strides = array<i32>} : memref<16x128xf32, #tpu.memory_space<vmem>>, vector<3x3xf32>,
    %187 = vector.extract_strided_slice %3 {offsets = [2, 2, 0], sizes = [1, 3, 3], strides = [1, 1, 1]} : vector<6x6x3xf32> to vector<1x3x3xf32>
    %188 = vector.shape_cast %187 : vector<1x3x3xf32> to vector<3x3xf32>
    %c0_109 = arith.constant 0 : index
    %c63 = arith.constant 63 : index
    %189 = vector.load %arg6[%c0_109, %c63] : memref<16x128xf32, #tpu.memory_space<vmem>>, vector<3x3xf32>
    tpu.vector_store %arg6[%c0_109, %c63], %188 {strides = array<i32>} : memref<16x128xf32, #tpu.memory_space<vmem>>, vector<3x3xf32>,
    %190 = vector.extract_strided_slice %2 {offsets = [3, 2, 0], sizes = [1, 3, 3], strides = [1, 1, 1]} : vector<6x6x3xf32> to vector<1x3x3xf32>
    %191 = vector.shape_cast %190 : vector<1x3x3xf32> to vector<3x3xf32>
    %c3_110 = arith.constant 3 : index
    %c60_111 = arith.constant 60 : index
    %192 = vector.load %arg6[%c3_110, %c60_111] : memref<16x128xf32, #tpu.memory_space<vmem>>, vector<3x3xf32>
    tpu.vector_store %arg6[%c3_110, %c60_111], %191 {strides = array<i32>} : memref<16x128xf32, #tpu.memory_space<vmem>>, vector<3x3xf32>,
    %193 = vector.extract_strided_slice %3 {offsets = [3, 2, 0], sizes = [1, 3, 3], strides = [1, 1, 1]} : vector<6x6x3xf32> to vector<1x3x3xf32>
    %194 = vector.shape_cast %193 : vector<1x3x3xf32> to vector<3x3xf32>
    %c3_112 = arith.constant 3 : index
    %c63_113 = arith.constant 63 : index
    %195 = vector.load %arg6[%c3_112, %c63_113] : memref<16x128xf32, #tpu.memory_space<vmem>>, vector<3x3xf32>
    tpu.vector_store %arg6[%c3_112, %c63_113], %194 {strides = array<i32>} : memref<16x128xf32, #tpu.memory_space<vmem>>, vector<3x3xf32>,
    %196 = vector.extract_strided_slice %2 {offsets = [4, 2, 0], sizes = [1, 3, 3], strides = [1, 1, 1]} : vector<6x6x3xf32> to vector<1x3x3xf32>
    %197 = vector.shape_cast %196 : vector<1x3x3xf32> to vector<3x3xf32>
    %c6_114 = arith.constant 6 : index
    %c60_115 = arith.constant 60 : index
    %198 = vector.load %arg6[%c6_114, %c60_115] : memref<16x128xf32, #tpu.memory_space<vmem>>, vector<3x3xf32>
    tpu.vector_store %arg6[%c6_114, %c60_115], %197 {strides = array<i32>} : memref<16x128xf32, #tpu.memory_space<vmem>>, vector<3x3xf32>,
    %199 = vector.extract_strided_slice %3 {offsets = [4, 2, 0], sizes = [1, 3, 3], strides = [1, 1, 1]} : vector<6x6x3xf32> to vector<1x3x3xf32>
    %200 = vector.shape_cast %199 : vector<1x3x3xf32> to vector<3x3xf32>
    %c6_116 = arith.constant 6 : index
    %c63_117 = arith.constant 63 : index
    %201 = vector.load %arg6[%c6_116, %c63_117] : memref<16x128xf32, #tpu.memory_space<vmem>>, vector<3x3xf32>
    tpu.vector_store %arg6[%c6_116, %c63_117], %200 {strides = array<i32>} : memref<16x128xf32, #tpu.memory_space<vmem>>, vector<3x3xf32>,
    %202 = vector.extract_strided_slice %2 {offsets = [2, 3, 0], sizes = [1, 3, 3], strides = [1, 1, 1]} : vector<6x6x3xf32> to vector<1x3x3xf32>
    %203 = vector.shape_cast %202 : vector<1x3x3xf32> to vector<3x3xf32>
    %c0_118 = arith.constant 0 : index
    %c66 = arith.constant 66 : index
    %204 = vector.load %arg6[%c0_118, %c66] : memref<16x128xf32, #tpu.memory_space<vmem>>, vector<3x3xf32>
    tpu.vector_store %arg6[%c0_118, %c66], %203 {strides = array<i32>} : memref<16x128xf32, #tpu.memory_space<vmem>>, vector<3x3xf32>,
    %205 = vector.extract_strided_slice %3 {offsets = [2, 3, 0], sizes = [1, 3, 3], strides = [1, 1, 1]} : vector<6x6x3xf32> to vector<1x3x3xf32>
    %206 = vector.shape_cast %205 : vector<1x3x3xf32> to vector<3x3xf32>
    %c0_119 = arith.constant 0 : index
    %c69 = arith.constant 69 : index
    %207 = vector.load %arg6[%c0_119, %c69] : memref<16x128xf32, #tpu.memory_space<vmem>>, vector<3x3xf32>
    tpu.vector_store %arg6[%c0_119, %c69], %206 {strides = array<i32>} : memref<16x128xf32, #tpu.memory_space<vmem>>, vector<3x3xf32>,
    %208 = vector.extract_strided_slice %2 {offsets = [3, 3, 0], sizes = [1, 3, 3], strides = [1, 1, 1]} : vector<6x6x3xf32> to vector<1x3x3xf32>
    %209 = vector.shape_cast %208 : vector<1x3x3xf32> to vector<3x3xf32>
    %c3_120 = arith.constant 3 : index
    %c66_121 = arith.constant 66 : index
    %210 = vector.load %arg6[%c3_120, %c66_121] : memref<16x128xf32, #tpu.memory_space<vmem>>, vector<3x3xf32>
    tpu.vector_store %arg6[%c3_120, %c66_121], %209 {strides = array<i32>} : memref<16x128xf32, #tpu.memory_space<vmem>>, vector<3x3xf32>,
    %211 = vector.extract_strided_slice %3 {offsets = [3, 3, 0], sizes = [1, 3, 3], strides = [1, 1, 1]} : vector<6x6x3xf32> to vector<1x3x3xf32>
    %212 = vector.shape_cast %211 : vector<1x3x3xf32> to vector<3x3xf32>
    %c3_122 = arith.constant 3 : index
    %c69_123 = arith.constant 69 : index
    %213 = vector.load %arg6[%c3_122, %c69_123] : memref<16x128xf32, #tpu.memory_space<vmem>>, vector<3x3xf32>
    tpu.vector_store %arg6[%c3_122, %c69_123], %212 {strides = array<i32>} : memref<16x128xf32, #tpu.memory_space<vmem>>, vector<3x3xf32>,
    %214 = vector.extract_strided_slice %2 {offsets = [4, 3, 0], sizes = [1, 3, 3], strides = [1, 1, 1]} : vector<6x6x3xf32> to vector<1x3x3xf32>
    %215 = vector.shape_cast %214 : vector<1x3x3xf32> to vector<3x3xf32>
    %c6_124 = arith.constant 6 : index
    %c66_125 = arith.constant 66 : index
    %216 = vector.load %arg6[%c6_124, %c66_125] : memref<16x128xf32, #tpu.memory_space<vmem>>, vector<3x3xf32>
    tpu.vector_store %arg6[%c6_124, %c66_125], %215 {strides = array<i32>} : memref<16x128xf32, #tpu.memory_space<vmem>>, vector<3x3xf32>,
    %217 = vector.extract_strided_slice %3 {offsets = [4, 3, 0], sizes = [1, 3, 3], strides = [1, 1, 1]} : vector<6x6x3xf32> to vector<1x3x3xf32>
    %218 = vector.shape_cast %217 : vector<1x3x3xf32> to vector<3x3xf32>
    %c6_126 = arith.constant 6 : index
    %c69_127 = arith.constant 69 : index
    %219 = vector.load %arg6[%c6_126, %c69_127] : memref<16x128xf32, #tpu.memory_space<vmem>>, vector<3x3xf32>
    tpu.vector_store %arg6[%c6_126, %c69_127], %218 {strides = array<i32>} : memref<16x128xf32, #tpu.memory_space<vmem>>, vector<3x3xf32>,
    %220 = vector.extract_strided_slice %2 {offsets = [3, 0, 0], sizes = [1, 3, 3], strides = [1, 1, 1]} : vector<6x6x3xf32> to vector<1x3x3xf32>
    %221 = vector.shape_cast %220 : vector<1x3x3xf32> to vector<3x3xf32>
    %c0_128 = arith.constant 0 : index
    %c72 = arith.constant 72 : index
    %222 = vector.load %arg6[%c0_128, %c72] : memref<16x128xf32, #tpu.memory_space<vmem>>, vector<3x3xf32>
    tpu.vector_store %arg6[%c0_128, %c72], %221 {strides = array<i32>} : memref<16x128xf32, #tpu.memory_space<vmem>>, vector<3x3xf32>,
    %223 = vector.extract_strided_slice %3 {offsets = [3, 0, 0], sizes = [1, 3, 3], strides = [1, 1, 1]} : vector<6x6x3xf32> to vector<1x3x3xf32>
    %224 = vector.shape_cast %223 : vector<1x3x3xf32> to vector<3x3xf32>
    %c0_129 = arith.constant 0 : index
    %c75 = arith.constant 75 : index
    %225 = vector.load %arg6[%c0_129, %c75] : memref<16x128xf32, #tpu.memory_space<vmem>>, vector<3x3xf32>
    tpu.vector_store %arg6[%c0_129, %c75], %224 {strides = array<i32>} : memref<16x128xf32, #tpu.memory_space<vmem>>, vector<3x3xf32>,
    %226 = vector.extract_strided_slice %2 {offsets = [4, 0, 0], sizes = [1, 3, 3], strides = [1, 1, 1]} : vector<6x6x3xf32> to vector<1x3x3xf32>
    %227 = vector.shape_cast %226 : vector<1x3x3xf32> to vector<3x3xf32>
    %c3_130 = arith.constant 3 : index
    %c72_131 = arith.constant 72 : index
    %228 = vector.load %arg6[%c3_130, %c72_131] : memref<16x128xf32, #tpu.memory_space<vmem>>, vector<3x3xf32>
    tpu.vector_store %arg6[%c3_130, %c72_131], %227 {strides = array<i32>} : memref<16x128xf32, #tpu.memory_space<vmem>>, vector<3x3xf32>,
    %229 = vector.extract_strided_slice %3 {offsets = [4, 0, 0], sizes = [1, 3, 3], strides = [1, 1, 1]} : vector<6x6x3xf32> to vector<1x3x3xf32>
    %230 = vector.shape_cast %229 : vector<1x3x3xf32> to vector<3x3xf32>
    %c3_132 = arith.constant 3 : index
    %c75_133 = arith.constant 75 : index
    %231 = vector.load %arg6[%c3_132, %c75_133] : memref<16x128xf32, #tpu.memory_space<vmem>>, vector<3x3xf32>
    tpu.vector_store %arg6[%c3_132, %c75_133], %230 {strides = array<i32>} : memref<16x128xf32, #tpu.memory_space<vmem>>, vector<3x3xf32>,
    %232 = vector.extract_strided_slice %2 {offsets = [5, 0, 0], sizes = [1, 3, 3], strides = [1, 1, 1]} : vector<6x6x3xf32> to vector<1x3x3xf32>
    %233 = vector.shape_cast %232 : vector<1x3x3xf32> to vector<3x3xf32>
    %c6_134 = arith.constant 6 : index
    %c72_135 = arith.constant 72 : index
    %234 = vector.load %arg6[%c6_134, %c72_135] : memref<16x128xf32, #tpu.memory_space<vmem>>, vector<3x3xf32>
    tpu.vector_store %arg6[%c6_134, %c72_135], %233 {strides = array<i32>} : memref<16x128xf32, #tpu.memory_space<vmem>>, vector<3x3xf32>,
    %235 = vector.extract_strided_slice %3 {offsets = [5, 0, 0], sizes = [1, 3, 3], strides = [1, 1, 1]} : vector<6x6x3xf32> to vector<1x3x3xf32>
    %236 = vector.shape_cast %235 : vector<1x3x3xf32> to vector<3x3xf32>
    %c6_136 = arith.constant 6 : index
    %c75_137 = arith.constant 75 : index
    %237 = vector.load %arg6[%c6_136, %c75_137] : memref<16x128xf32, #tpu.memory_space<vmem>>, vector<3x3xf32>
    tpu.vector_store %arg6[%c6_136, %c75_137], %236 {strides = array<i32>} : memref<16x128xf32, #tpu.memory_space<vmem>>, vector<3x3xf32>,
    %238 = vector.extract_strided_slice %2 {offsets = [3, 1, 0], sizes = [1, 3, 3], strides = [1, 1, 1]} : vector<6x6x3xf32> to vector<1x3x3xf32>
    %239 = vector.shape_cast %238 : vector<1x3x3xf32> to vector<3x3xf32>
    %c0_138 = arith.constant 0 : index
    %c78 = arith.constant 78 : index
    %240 = vector.load %arg6[%c0_138, %c78] : memref<16x128xf32, #tpu.memory_space<vmem>>, vector<3x3xf32>
    tpu.vector_store %arg6[%c0_138, %c78], %239 {strides = array<i32>} : memref<16x128xf32, #tpu.memory_space<vmem>>, vector<3x3xf32>,
    %241 = vector.extract_strided_slice %3 {offsets = [3, 1, 0], sizes = [1, 3, 3], strides = [1, 1, 1]} : vector<6x6x3xf32> to vector<1x3x3xf32>
    %242 = vector.shape_cast %241 : vector<1x3x3xf32> to vector<3x3xf32>
    %c0_139 = arith.constant 0 : index
    %c81 = arith.constant 81 : index
    %243 = vector.load %arg6[%c0_139, %c81] : memref<16x128xf32, #tpu.memory_space<vmem>>, vector<3x3xf32>
    tpu.vector_store %arg6[%c0_139, %c81], %242 {strides = array<i32>} : memref<16x128xf32, #tpu.memory_space<vmem>>, vector<3x3xf32>,
    %244 = vector.extract_strided_slice %2 {offsets = [4, 1, 0], sizes = [1, 3, 3], strides = [1, 1, 1]} : vector<6x6x3xf32> to vector<1x3x3xf32>
    %245 = vector.shape_cast %244 : vector<1x3x3xf32> to vector<3x3xf32>
    %c3_140 = arith.constant 3 : index
    %c78_141 = arith.constant 78 : index
    %246 = vector.load %arg6[%c3_140, %c78_141] : memref<16x128xf32, #tpu.memory_space<vmem>>, vector<3x3xf32>
    tpu.vector_store %arg6[%c3_140, %c78_141], %245 {strides = array<i32>} : memref<16x128xf32, #tpu.memory_space<vmem>>, vector<3x3xf32>,
    %247 = vector.extract_strided_slice %3 {offsets = [4, 1, 0], sizes = [1, 3, 3], strides = [1, 1, 1]} : vector<6x6x3xf32> to vector<1x3x3xf32>
    %248 = vector.shape_cast %247 : vector<1x3x3xf32> to vector<3x3xf32>
    %c3_142 = arith.constant 3 : index
    %c81_143 = arith.constant 81 : index
    %249 = vector.load %arg6[%c3_142, %c81_143] : memref<16x128xf32, #tpu.memory_space<vmem>>, vector<3x3xf32>
    tpu.vector_store %arg6[%c3_142, %c81_143], %248 {strides = array<i32>} : memref<16x128xf32, #tpu.memory_space<vmem>>, vector<3x3xf32>,
    %250 = vector.extract_strided_slice %2 {offsets = [5, 1, 0], sizes = [1, 3, 3], strides = [1, 1, 1]} : vector<6x6x3xf32> to vector<1x3x3xf32>
    %251 = vector.shape_cast %250 : vector<1x3x3xf32> to vector<3x3xf32>
    %c6_144 = arith.constant 6 : index
    %c78_145 = arith.constant 78 : index
    %252 = vector.load %arg6[%c6_144, %c78_145] : memref<16x128xf32, #tpu.memory_space<vmem>>, vector<3x3xf32>
    tpu.vector_store %arg6[%c6_144, %c78_145], %251 {strides = array<i32>} : memref<16x128xf32, #tpu.memory_space<vmem>>, vector<3x3xf32>,
    %253 = vector.extract_strided_slice %3 {offsets = [5, 1, 0], sizes = [1, 3, 3], strides = [1, 1, 1]} : vector<6x6x3xf32> to vector<1x3x3xf32>
    %254 = vector.shape_cast %253 : vector<1x3x3xf32> to vector<3x3xf32>
    %c6_146 = arith.constant 6 : index
    %c81_147 = arith.constant 81 : index
    %255 = vector.load %arg6[%c6_146, %c81_147] : memref<16x128xf32, #tpu.memory_space<vmem>>, vector<3x3xf32>
    tpu.vector_store %arg6[%c6_146, %c81_147], %254 {strides = array<i32>} : memref<16x128xf32, #tpu.memory_space<vmem>>, vector<3x3xf32>,
    %256 = vector.extract_strided_slice %2 {offsets = [3, 2, 0], sizes = [1, 3, 3], strides = [1, 1, 1]} : vector<6x6x3xf32> to vector<1x3x3xf32>
    %257 = vector.shape_cast %256 : vector<1x3x3xf32> to vector<3x3xf32>
    %c0_148 = arith.constant 0 : index
    %c84 = arith.constant 84 : index
    %258 = vector.load %arg6[%c0_148, %c84] : memref<16x128xf32, #tpu.memory_space<vmem>>, vector<3x3xf32>
    tpu.vector_store %arg6[%c0_148, %c84], %257 {strides = array<i32>} : memref<16x128xf32, #tpu.memory_space<vmem>>, vector<3x3xf32>,
    %259 = vector.extract_strided_slice %3 {offsets = [3, 2, 0], sizes = [1, 3, 3], strides = [1, 1, 1]} : vector<6x6x3xf32> to vector<1x3x3xf32>
    %260 = vector.shape_cast %259 : vector<1x3x3xf32> to vector<3x3xf32>
    %c0_149 = arith.constant 0 : index
    %c87 = arith.constant 87 : index
    %261 = vector.load %arg6[%c0_149, %c87] : memref<16x128xf32, #tpu.memory_space<vmem>>, vector<3x3xf32>
    tpu.vector_store %arg6[%c0_149, %c87], %260 {strides = array<i32>} : memref<16x128xf32, #tpu.memory_space<vmem>>, vector<3x3xf32>,
    %262 = vector.extract_strided_slice %2 {offsets = [4, 2, 0], sizes = [1, 3, 3], strides = [1, 1, 1]} : vector<6x6x3xf32> to vector<1x3x3xf32>
    %263 = vector.shape_cast %262 : vector<1x3x3xf32> to vector<3x3xf32>
    %c3_150 = arith.constant 3 : index
    %c84_151 = arith.constant 84 : index
    %264 = vector.load %arg6[%c3_150, %c84_151] : memref<16x128xf32, #tpu.memory_space<vmem>>, vector<3x3xf32>
    tpu.vector_store %arg6[%c3_150, %c84_151], %263 {strides = array<i32>} : memref<16x128xf32, #tpu.memory_space<vmem>>, vector<3x3xf32>,
    %265 = vector.extract_strided_slice %3 {offsets = [4, 2, 0], sizes = [1, 3, 3], strides = [1, 1, 1]} : vector<6x6x3xf32> to vector<1x3x3xf32>
    %266 = vector.shape_cast %265 : vector<1x3x3xf32> to vector<3x3xf32>
    %c3_152 = arith.constant 3 : index
    %c87_153 = arith.constant 87 : index
    %267 = vector.load %arg6[%c3_152, %c87_153] : memref<16x128xf32, #tpu.memory_space<vmem>>, vector<3x3xf32>
    tpu.vector_store %arg6[%c3_152, %c87_153], %266 {strides = array<i32>} : memref<16x128xf32, #tpu.memory_space<vmem>>, vector<3x3xf32>,
    %268 = vector.extract_strided_slice %2 {offsets = [5, 2, 0], sizes = [1, 3, 3], strides = [1, 1, 1]} : vector<6x6x3xf32> to vector<1x3x3xf32>
    %269 = vector.shape_cast %268 : vector<1x3x3xf32> to vector<3x3xf32>
    %c6_154 = arith.constant 6 : index
    %c84_155 = arith.constant 84 : index
    %270 = vector.load %arg6[%c6_154, %c84_155] : memref<16x128xf32, #tpu.memory_space<vmem>>, vector<3x3xf32>
    tpu.vector_store %arg6[%c6_154, %c84_155], %269 {strides = array<i32>} : memref<16x128xf32, #tpu.memory_space<vmem>>, vector<3x3xf32>,
    %271 = vector.extract_strided_slice %3 {offsets = [5, 2, 0], sizes = [1, 3, 3], strides = [1, 1, 1]} : vector<6x6x3xf32> to vector<1x3x3xf32>
    %272 = vector.shape_cast %271 : vector<1x3x3xf32> to vector<3x3xf32>
    %c6_156 = arith.constant 6 : index
    %c87_157 = arith.constant 87 : index
    %273 = vector.load %arg6[%c6_156, %c87_157] : memref<16x128xf32, #tpu.memory_space<vmem>>, vector<3x3xf32>
    tpu.vector_store %arg6[%c6_156, %c87_157], %272 {strides = array<i32>} : memref<16x128xf32, #tpu.memory_space<vmem>>, vector<3x3xf32>,
    %274 = vector.extract_strided_slice %2 {offsets = [3, 3, 0], sizes = [1, 3, 3], strides = [1, 1, 1]} : vector<6x6x3xf32> to vector<1x3x3xf32>
    %275 = vector.shape_cast %274 : vector<1x3x3xf32> to vector<3x3xf32>
    %c0_158 = arith.constant 0 : index
    %c90 = arith.constant 90 : index
    %276 = vector.load %arg6[%c0_158, %c90] : memref<16x128xf32, #tpu.memory_space<vmem>>, vector<3x3xf32>
    tpu.vector_store %arg6[%c0_158, %c90], %275 {strides = array<i32>} : memref<16x128xf32, #tpu.memory_space<vmem>>, vector<3x3xf32>,
    %277 = vector.extract_strided_slice %3 {offsets = [3, 3, 0], sizes = [1, 3, 3], strides = [1, 1, 1]} : vector<6x6x3xf32> to vector<1x3x3xf32>
    %278 = vector.shape_cast %277 : vector<1x3x3xf32> to vector<3x3xf32>
    %c0_159 = arith.constant 0 : index
    %c93 = arith.constant 93 : index
    %279 = vector.load %arg6[%c0_159, %c93] : memref<16x128xf32, #tpu.memory_space<vmem>>, vector<3x3xf32>
    tpu.vector_store %arg6[%c0_159, %c93], %278 {strides = array<i32>} : memref<16x128xf32, #tpu.memory_space<vmem>>, vector<3x3xf32>,
    %280 = vector.extract_strided_slice %2 {offsets = [4, 3, 0], sizes = [1, 3, 3], strides = [1, 1, 1]} : vector<6x6x3xf32> to vector<1x3x3xf32>
    %281 = vector.shape_cast %280 : vector<1x3x3xf32> to vector<3x3xf32>
    %c3_160 = arith.constant 3 : index
    %c90_161 = arith.constant 90 : index
    %282 = vector.load %arg6[%c3_160, %c90_161] : memref<16x128xf32, #tpu.memory_space<vmem>>, vector<3x3xf32>
    tpu.vector_store %arg6[%c3_160, %c90_161], %281 {strides = array<i32>} : memref<16x128xf32, #tpu.memory_space<vmem>>, vector<3x3xf32>,
    %283 = vector.extract_strided_slice %3 {offsets = [4, 3, 0], sizes = [1, 3, 3], strides = [1, 1, 1]} : vector<6x6x3xf32> to vector<1x3x3xf32>
    %284 = vector.shape_cast %283 : vector<1x3x3xf32> to vector<3x3xf32>
    %c3_162 = arith.constant 3 : index
    %c93_163 = arith.constant 93 : index
    %285 = vector.load %arg6[%c3_162, %c93_163] : memref<16x128xf32, #tpu.memory_space<vmem>>, vector<3x3xf32>
    tpu.vector_store %arg6[%c3_162, %c93_163], %284 {strides = array<i32>} : memref<16x128xf32, #tpu.memory_space<vmem>>, vector<3x3xf32>,
    %286 = vector.extract_strided_slice %2 {offsets = [5, 3, 0], sizes = [1, 3, 3], strides = [1, 1, 1]} : vector<6x6x3xf32> to vector<1x3x3xf32>
    %287 = vector.shape_cast %286 : vector<1x3x3xf32> to vector<3x3xf32>
    %c6_164 = arith.constant 6 : index
    %c90_165 = arith.constant 90 : index
    %288 = vector.load %arg6[%c6_164, %c90_165] : memref<16x128xf32, #tpu.memory_space<vmem>>, vector<3x3xf32>
    tpu.vector_store %arg6[%c6_164, %c90_165], %287 {strides = array<i32>} : memref<16x128xf32, #tpu.memory_space<vmem>>, vector<3x3xf32>,
    %289 = vector.extract_strided_slice %3 {offsets = [5, 3, 0], sizes = [1, 3, 3], strides = [1, 1, 1]} : vector<6x6x3xf32> to vector<1x3x3xf32>
    %290 = vector.shape_cast %289 : vector<1x3x3xf32> to vector<3x3xf32>
    %c6_166 = arith.constant 6 : index
    %c93_167 = arith.constant 93 : index
    %291 = vector.load %arg6[%c6_166, %c93_167] : memref<16x128xf32, #tpu.memory_space<vmem>>, vector<3x3xf32>
    tpu.vector_store %arg6[%c6_166, %c93_167], %290 {strides = array<i32>} : memref<16x128xf32, #tpu.memory_space<vmem>>, vector<3x3xf32>,
    %c0_168 = arith.constant 0 : index
    %c0_169 = arith.constant 0 : index
    %292 = vector.load %arg6[%c0_168, %c0_169] : memref<16x128xf32, #tpu.memory_space<vmem>>, vector<16x128xf32>
    %c0_170 = arith.constant 0 : index
    %c0_171 = arith.constant 0 : index
    %293 = vector.load %arg3[%c0_170, %c0_171] : memref<128x128xf32, #tpu.memory_space<vmem>>, vector<128x128xf32>
    %cst_172 = arith.constant dense<0.000000e+00> : vector<16x128xf32>
    %294 = tpu.matmul %292, %293, %cst_172 {dimension_numbers = #tpu.dot_dimension_numbers<[1], [0], [0], [1], [0, 0, 1, 1], [], []>} : vector<16x128xf32>, vector<128x128xf32>, vector<16x128xf32> -> vector<16x128xf32>
    %cst_173 = arith.constant dense<0.000000e+00> : vector<128xf32>
    %295 = vector.multi_reduction <add>, %294, %cst_173 [0] : vector<16x128xf32> to vector<128xf32>
    %296 = vector.shape_cast %295 : vector<128xf32> to vector<1x128xf32>
    %cst_174 = arith.constant 0.111111112 : f32
    %297 = vector.broadcast %cst_174 : f32 to vector<1x128xf32>
    %298 = arith.mulf %296, %297 : vector<1x128xf32>
    %299 = arith.mulf %294, %294 : vector<16x128xf32>
    %cst_175 = arith.constant dense<0.000000e+00> : vector<128xf32>
    %300 = vector.multi_reduction <add>, %299, %cst_175 [0] : vector<16x128xf32> to vector<128xf32>
    %301 = vector.shape_cast %300 : vector<128xf32> to vector<1x128xf32>
    %cst_176 = arith.constant 0.111111112 : f32
    %302 = vector.broadcast %cst_176 : f32 to vector<1x128xf32>
    %303 = arith.mulf %301, %302 : vector<1x128xf32>
    %304 = arith.mulf %298, %298 : vector<1x128xf32>
    %305 = arith.subf %303, %304 : vector<1x128xf32>
    %cst_177 = arith.constant 0.000000e+00 : f32
    %306 = vector.broadcast %cst_177 : f32 to vector<1x128xf32>
    %307 = arith.maximumf %305, %306 : vector<1x128xf32>
    %cst_178 = arith.constant 9.99999974E-6 : f32
    %308 = vector.broadcast %cst_178 : f32 to vector<1x128xf32>
    %309 = arith.addf %307, %308 : vector<1x128xf32>
    %310 = math.rsqrt %309 : vector<1x128xf32>
    %c0_179 = arith.constant 0 : index
    %c0_180 = arith.constant 0 : index
    %311 = vector.load %arg4[%c0_179, %c0_180] : memref<2x128xf32, #tpu.memory_space<vmem>>, vector<1x128xf32>
    %312 = arith.mulf %311, %310 : vector<1x128xf32>
    %c1 = arith.constant 1 : index
    %c0_181 = arith.constant 0 : index
    %313 = vector.load %arg4[%c1, %c0_181] : memref<2x128xf32, #tpu.memory_space<vmem>>, vector<1x128xf32>
    %314 = arith.mulf %298, %312 : vector<1x128xf32>
    %315 = arith.subf %313, %314 : vector<1x128xf32>
    %316 = vector.broadcast %312 : vector<1x128xf32> to vector<16x128xf32>
    %317 = arith.mulf %294, %316 : vector<16x128xf32>
    %318 = vector.broadcast %315 : vector<1x128xf32> to vector<16x128xf32>
    %319 = arith.addf %317, %318 : vector<16x128xf32>
    %c0_182 = arith.constant 0 : index
    %c0_183 = arith.constant 0 : index
    %320 = vector.load %arg5[%c0_182, %c0_183] : memref<16x128xf32, #tpu.memory_space<vmem>>, vector<16x128xf32>
    tpu.vector_store %arg5[%c0_182, %c0_183], %319 {strides = array<i32>} : memref<16x128xf32, #tpu.memory_space<vmem>>, vector<16x128xf32>,
    return
  }
  func.func @transform_0(%arg0: i32) -> (i32, i32, i32) {
    %c0_i32 = arith.constant 0 : i32
    %c0_i32_0 = arith.constant 0 : i32
    %c0_i32_1 = arith.constant 0 : i32
    %c0_i32_2 = arith.constant 0 : i32
    return %c0_i32, %c0_i32_0, %c0_i32_1 : i32, i32, i32
  }
  func.func @transform_1(%arg0: i32) -> (i32, i32, i32) {
    %c0_i32 = arith.constant 0 : i32
    %c0_i32_0 = arith.constant 0 : i32
    %c0_i32_1 = arith.constant 0 : i32
    %c0_i32_2 = arith.constant 0 : i32
    return %c0_i32, %c0_i32_0, %c0_i32_1 : i32, i32, i32
  }
  func.func @transform_2(%arg0: i32) -> (i32, i32) {
    %c0_i32 = arith.constant 0 : i32
    %c0_i32_0 = arith.constant 0 : i32
    %c0_i32_1 = arith.constant 0 : i32
    return %c0_i32, %c0_i32_0 : i32, i32
  }
  func.func @transform_3(%arg0: i32) -> (i32, i32) {
    %c0_i32 = arith.constant 0 : i32
    %c0_i32_0 = arith.constant 0 : i32
    %c0_i32_1 = arith.constant 0 : i32
    return %c0_i32, %c0_i32_0 : i32, i32
  }
  func.func @transform_4(%arg0: i32) -> (i32, i32) {
    %c0_i32 = arith.constant 0 : i32
    %c0_i32_0 = arith.constant 0 : i32
    %c0_i32_1 = arith.constant 0 : i32
    return %c0_i32, %c0_i32_0 : i32, i32
  }
}

</mosaic_0001>

<bundles_post_ra>
// kernel: fused_forward.1
= control target key start
LH: loop header
LB: loop body
LE: loop exit
PB: predicated region body
PF: predicated region fallthrough
CT: control target
= control target key end

     0   :  { %v676_v2 = vmov 0.0   ;;  %vm31_vm0 = vcmask 18432   ;;  %s677_s19 = smov 3   ;;  %s678_s28 = smov 6   ;;  %vm37_vm1 = vcmask 43032   ;;  %vm55_vm2 = vcmask 68657   ;;  %s935_s1 = inlined_call_operand.vmem [shape: f32[6,6,3], index: 1, kind: input, shape index: {}]   ;;  %s936_s0 = inlined_call_operand.vmem [shape: f32[6,6,3], index: 0, kind: input, shape index: {}]   ;;  %s937_s2 = inlined_call_operand.vmem [shape: f32[128,128], index: 2, kind: input, shape index: {}]   ;;  %s938_s3 = inlined_call_operand.vmem [shape: f32[2,128], index: 3, kind: input, shape index: {}]   ;;  %s939_s4 = inlined_call_operand.vmem [shape: f32[16,128], index: 4, kind: output, shape index: {}]  }
   0x1   :  { %v25_v0 = vld [vmem:[%s935_s1] sm:$0x3f]  ;;  %v739_v1 = vld [vmem:[%s935_s1 + $0x10] sm:$0x3f]  ;;  %17 = vst [vmem:[#allocation2] sm:$0xff] %v676_v2  ;;  %18 = vst [vmem:[#allocation2 + $0x8] sm:$0xff] %v676_v2 }
   0x2   :  { %34 = vrot.lane.b32.xlu0 %v25_v0, %s677_s19  ;;  %47 = vrot.lane.b32.xlu1 %v739_v1, %s677_s19  ;;  %v20_v3 = vld [vmem:[%s936_s0 + $0x8] sm:$0x3f]  ;;  %v751_v5 = vld [vmem:[%s936_s0 + $0x10] sm:$0x3f]  ;;  %s679_s29 = smov 9   ;;  %s680_s30 = smov 12  }
   0x3   :  { %v26_v4 = vld [vmem:[%s935_s1 + $0x8] sm:$0x3f]  ;;  %v19_v6 = vld [vmem:[%s936_s0] sm:$0x3f]  ;;  %39 = vst.msk [vmem:[#allocation2 + $0x3] sm:$0x7] %vm31_vm0, %v20_v3 }
   0x4   :  { %32 = vst.msk [vmem:[#allocation2] sm:$0x7] %vm31_vm0, %v19_v6  ;;  %45 = vst.msk [vmem:[#allocation2 + $0x6] sm:$0x7] %vm31_vm0, %v751_v5  ;;  %s681_s5 = smov 15   ;;  %s682_s6 = smov 18  }
   0x5   :  { %s683_s7 = smov 21   ;;  %s684_s8 = smov 24   ;;  %v766_v7 = vld [vmem:[%s936_s0 + $0x18] sm:$0x3f]  ;;  %v793_v9 = vld [vmem:[%s936_s0 + $0x20] sm:$0x3f] }
   0x6   :  { %41 = vrot.lane.b32.xlu0 %v26_v4, %s677_s19  ;;  %52 = vrot.lane.b32.xlu1 %v19_v6, %s678_s28  ;;  %s685_s11 = smov 27   ;;  %v774_v8 = vld [vmem:[%s935_s1 + $0x18] sm:$0x3f]  ;;  %s686_s14 = smov 30   ;;  %v802_v10 = vld [vmem:[%s935_s1 + $0x20] sm:$0x3f] }
   0x7   :  { %s687_s15 = smov 33   ;;  %s688_s16 = smov 36   ;;  %vm60_vm3 = vcmask 93257   ;;  %vm83_vm4 = vcmask 118882   ;;  %vm88_vm5 = vcmask 143482   ;;  %vm109_vm6 = vcmask 169107  }
   0x8   :  { %s689_s17 = smov 39   ;;  %s690_s18 = smov 42   ;;  %v827_v23 = vld [vmem:[%s936_s0 + $0x28] sm:$0x3f]  ;;  %v467_v31 = vld [vmem:[%s937_s2 + $0x78] sm:$0xff]  ;;  %vm114_vm7 = vcmask 193707  }
   0x9   :  { %s691_s19 = smov 45   ;;  %s692_s20 = smov 48   ;;  %v836_v28 = vld [vmem:[%s935_s1 + $0x28] sm:$0x3f]  ;;  %v466_v32 = vld [vmem:[%s937_s2 + $0x70] sm:$0xff]  ;;  %607 = vmatprep.subr.mxu0 %v467_v31  ;;  %vm135_vm8 = vcmask 215232  }
   0xa   :  { %63 = vrot.lane.b32.xlu0 %v20_v3, %s678_s28  ;;  %72 = vrot.lane.b32.xlu1 %v751_v5, %s678_s28  ;;  %s693_s23 = smov 51   ;;  %s694_s26 = smov 54   ;;  %v465_v35 = vld [vmem:[%s937_s2 + $0x68] sm:$0xff]  ;;  %v464_v38 = vld [vmem:[%s937_s2 + $0x60] sm:$0xff]  ;;  %vm140_vm9 = vcmask 239832   ;;  %vm163_vm10 = vcmask 265457  }
   0xb   :  { %s695_s27 = smov 57   ;;  %s696_s28 = smov 60   ;;  %608 = vmatpush3.msra.mxu0 %v467_v31  ;;  %v463_v39 = vld [vmem:[%s937_s2 + $0x58] sm:$0xff]  ;;  %v462_v42 = vld [vmem:[%s937_s2 + $0x50] sm:$0xff]  ;;  %v461_v45 = vld [vmem:[%s937_s2 + $0x48] sm:$0xff]  ;;  %vm168_vm11 = vcmask 290057  }
   0xc   :  { %s701_s9 = smov 75   ;;  %s702_s13 = smov 78   ;;  %609 = vmatprep.subr.mxu0 %v466_v32  ;;  %v460_v46 = vld [vmem:[%s937_s2 + $0x40] sm:$0xff]  ;;  %v459_v49 = vld [vmem:[%s937_s2 + $0x38] sm:$0xff]  ;;  %v458_v52 = vld [vmem:[%s937_s2 + $0x30] sm:$0xff]  ;;  %vm189_vm12 = vcmask 315682  }
   0xd   :  { %610 = vmatpush3.msra.mxu0 %v466_v32  ;;  %s704_s24 = smov 84   ;;  %v457_v53 = vld [vmem:[%s937_s2 + $0x28] sm:$0xff]  ;;  %v456_v56 = vld [vmem:[%s937_s2 + $0x20] sm:$0xff]  ;;  %v455_v59 = vld [vmem:[%s937_s2 + $0x18] sm:$0xff]  ;;  %vm194_vm13 = vcmask 340282   ;;  %vm215_vm14 = vcmask 365907  }
   0xe   :  { %57 = vrot.lane.b32.xlu0 %v25_v0, %s679_s29  ;;  %67 = vrot.lane.b32.xlu1 %v26_v4, %s679_s29  ;;  %v454_v60 = vld [vmem:[%s937_s2 + $0x10] sm:$0xff]  ;;  %v453_v63 = vld [vmem:[%s937_s2 + $0x8] sm:$0xff]  ;;  %vm220_vm15 = vcmask 390507   ;;  %vm241_vm0 = vcmask 412032  }
   0xf   :  { %611 = vmatprep.subr.mxu0 %v465_v35 }
  0x10   :  { %612 = vmatpush3.msra.mxu0 %v465_v35 }
  0x11   :  { %613 = vmatprep.subr.mxu0 %v464_v38 }
  0x12   :  { %76 = vrot.lane.b32.xlu0 %v739_v1, %s679_s29  ;;  %80 = vrot.lane.b32.xlu1 %v19_v6, %s680_s30  ;;  %s697_s29 = smov 63  }
  0x13   :  { %614 = vmatpush3.msra.mxu0 %v464_v38 }
  0x14   :  { %615 = vmatprep.subr.mxu0 %v463_v39 }
  0x15   :  { %616 = vmatpush3.msra.mxu0 %v463_v39 }
  0x16   :  { %90 = vrot.lane.b32.xlu0 %v20_v3, %s680_s30  ;;  %98 = vrot.lane.b32.xlu1 %v751_v5, %s680_s30  ;;  %s698_s30 = smov 66  }
  0x17   :  { %617 = vmatprep.subr.mxu0 %v462_v42 }
  0x18   :  { %618 = vmatpush3.msra.mxu0 %v462_v42 }
  0x19   :  { %619 = vmatprep.subr.mxu0 %v461_v45 }
  0x1a   :  { %85 = vrot.lane.b32.xlu0 %v25_v0, %s681_s5  ;;  %94 = vrot.lane.b32.xlu1 %v26_v4, %s681_s5 }
  0x1b   :  { %620 = vmatpush3.msra.mxu0 %v461_v45 }
  0x1c   :  { %621 = vmatprep.subr.mxu0 %v460_v46 }
  0x1d   :  { %622 = vmatpush3.msra.mxu0 %v460_v46 }
  0x1e   :  { %102 = vrot.lane.b32.xlu0 %v739_v1, %s681_s5  ;;  %106 = vrot.lane.b32.xlu1 %v19_v6, %s682_s6  ;;  %s699_s5 = smov 69  }
  0x1f   :  { %623 = vmatprep.subr.mxu0 %v459_v49 }
  0x20   :  { %624 = vmatpush3.msra.mxu0 %v459_v49 }
  0x21   :  { %625 = vmatprep.subr.mxu0 %v458_v52 }
  0x22   :  { %116 = vrot.lane.b32.xlu0 %v20_v3, %s682_s6  ;;  %124 = vrot.lane.b32.xlu1 %v751_v5, %s682_s6  ;;  %s700_s6 = smov 72  }
  0x23   :  { %626 = vmatpush3.msra.mxu0 %v458_v52 }
  0x24   :  { %627 = vmatprep.subr.mxu0 %v457_v53 }
  0x25   :  { %628 = vmatpush3.msra.mxu0 %v457_v53 }
  0x26   :  { %111 = vrot.lane.b32.xlu0 %v25_v0, %s683_s7  ;;  %120 = vrot.lane.b32.xlu1 %v26_v4, %s683_s7  ;;  %v452_v0 = vld [vmem:[%s937_s2] sm:$0xff] }
  0x27   :  { %629 = vmatprep.subr.mxu0 %v456_v56 }
  0x28   :  { %630 = vmatpush3.msra.mxu0 %v456_v56 }
  0x29   :  { %631 = vmatprep.subr.mxu0 %v455_v59 }
  0x2a   :  { %128 = vrot.lane.b32.xlu0 %v739_v1, %s683_s7  ;;  %132 = vrot.lane.b32.xlu1 %v20_v3, %s684_s8 }
  0x2b   :  { %632 = vmatpush3.msra.mxu0 %v455_v59 }
  0x2c   :  { %633 = vmatprep.subr.mxu0 %v454_v60 }
  0x2d   :  { %634 = vmatpush3.msra.mxu0 %v454_v60 }
  0x2e   :  { %142 = vrot.lane.b32.xlu0 %v751_v5, %s684_s8  ;;  %151 = vrot.lane.b32.xlu1 %v766_v7, %s684_s8  ;;  %s706_s8 = smov 90  }
  0x2f   :  { %635 = vmatprep.subr.mxu0 %v453_v63 }
  0x30   :  { %636 = vmatpush3.msra.mxu0 %v453_v63 }
  0x31   :  { %637 = vmatprep.subr.mxu0 %v452_v0 }
  0x32   :  { %137 = vrot.lane.b32.xlu0 %v26_v4, %s685_s11  ;;  %146 = vrot.lane.b32.xlu1 %v739_v1, %s685_s11 }
  0x33   :  { %638 = vmatpush3.msra.mxu0 %v452_v0 }
  0x36   :  { %156 = vrot.lane.b32.xlu0 %v774_v8, %s685_s11  ;;  %160 = vrot.lane.b32.xlu1 %v20_v3, %s686_s14 }
  0x3a   :  { %170 = vrot.lane.b32.xlu0 %v751_v5, %s686_s14  ;;  %178 = vrot.lane.b32.xlu1 %v766_v7, %s686_s14  ;;  %s707_s14 = smov 93  }
  0x3e   :  { %165 = vrot.lane.b32.xlu0 %v26_v4, %s687_s15  ;;  %174 = vrot.lane.b32.xlu1 %v739_v1, %s687_s15 }
  0x42   :  { %182 = vrot.lane.b32.xlu0 %v774_v8, %s687_s15  ;;  %186 = vrot.lane.b32.xlu1 %v20_v3, %s688_s16 }
  0x46   :  { %196 = vrot.lane.b32.xlu0 %v751_v5, %s688_s16  ;;  %204 = vrot.lane.b32.xlu1 %v766_v7, %s688_s16 }
  0x4a   :  { %191 = vrot.lane.b32.xlu0 %v26_v4, %s689_s17  ;;  %200 = vrot.lane.b32.xlu1 %v739_v1, %s689_s17 }
  0x4e   :  { %208 = vrot.lane.b32.xlu0 %v774_v8, %s689_s17  ;;  %212 = vrot.lane.b32.xlu1 %v20_v3, %s690_s18 }
  0x52   :  { %222 = vrot.lane.b32.xlu0 %v751_v5, %s690_s18  ;;  %230 = vrot.lane.b32.xlu1 %v766_v7, %s690_s18 }
  0x56   :  { %217 = vrot.lane.b32.xlu0 %v26_v4, %s691_s19  ;;  %226 = vrot.lane.b32.xlu1 %v739_v1, %s691_s19 }
  0x5a   :  { %234 = vrot.lane.b32.xlu0 %v774_v8, %s691_s19  ;;  %238 = vrot.lane.b32.xlu1 %v751_v5, %s692_s20  ;;  %s703_s19 = smov 81  }
  0x5e   :  { %248 = vrot.lane.b32.xlu0 %v766_v7, %s692_s20  ;;  %257 = vrot.lane.b32.xlu1 %v793_v9, %s692_s20 }
  0x62   :  { %243 = vrot.lane.b32.xlu0 %v739_v1, %s693_s23  ;;  %252 = vrot.lane.b32.xlu1 %v774_v8, %s693_s23 }
  0x66   :  { %262 = vrot.lane.b32.xlu0 %v802_v10, %s693_s23  ;;  %266 = vrot.lane.b32.xlu1 %v751_v5, %s694_s26 }
  0x6a   :  { %276 = vrot.lane.b32.xlu0 %v766_v7, %s694_s26  ;;  %284 = vrot.lane.b32.xlu1 %v793_v9, %s694_s26 }
  0x6e   :  { %271 = vrot.lane.b32.xlu0 %v739_v1, %s695_s27  ;;  %280 = vrot.lane.b32.xlu1 %v774_v8, %s695_s27 }
  0x72   :  { %288 = vrot.lane.b32.xlu0 %v802_v10, %s695_s27  ;;  %292 = vrot.lane.b32.xlu1 %v751_v5, %s696_s28 }
  0x74   :  { %v35_v11 = vpop.permute.xlu0 %34  ;;  %v48_v12 = vpop.permute.xlu1 %47 }
  0x75   :  { %38 = vst.msk [vmem:[#allocation2] sm:$0x7] %vm37_vm1, %v35_v11  ;;  %50 = vst.msk [vmem:[#allocation2 + $0x6] sm:$0x7] %vm37_vm1, %v48_v12 }
  0x76   :  { %302 = vrot.lane.b32.xlu0 %v766_v7, %s696_s28  ;;  %310 = vrot.lane.b32.xlu1 %v793_v9, %s696_s28 }
  0x78   :  { %v42_v13 = vpop.permute.xlu0 %41  ;;  %v53_v14 = vpop.permute.xlu1 %52 }
  0x79   :  { %44 = vst.msk [vmem:[#allocation2 + $0x3] sm:$0x7] %vm37_vm1, %v42_v13  ;;  %vm246_vm1 = vcmask 436632  }
  0x7a   :  { %56 = vst.msk [vmem:[#allocation2 - $0x1] sm:$0xe] %vm55_vm2, %v53_v14  ;;  %297 = vrot.lane.b32.xlu0 %v739_v1, %s697_s29  ;;  %306 = vrot.lane.b32.xlu1 %v774_v8, %s697_s29 }
  0x7c   :  { %v64_v15 = vpop.permute.xlu0 %63  ;;  %v73_v16 = vpop.permute.xlu1 %72 }
  0x7d   :  { %66 = vst.msk [vmem:[#allocation2 + $0x2] sm:$0xe] %vm55_vm2, %v64_v15  ;;  %75 = vst.msk [vmem:[#allocation2 + $0x5] sm:$0xe] %vm55_vm2, %v73_v16  ;;  %vm269_vm2 = vcmask 462257  }
  0x7e   :  { %314 = vrot.lane.b32.xlu0 %v802_v10, %s697_s29  ;;  %318 = vrot.lane.b32.xlu1 %v751_v5, %s698_s30 }
  0x80   :  { %v58_v17 = vpop.permute.xlu0 %57  ;;  %v68_v18 = vpop.permute.xlu1 %67 }
  0x81   :  { %61 = vst.msk [vmem:[#allocation2 - $0x1] sm:$0xe] %vm60_vm3, %v58_v17  ;;  %70 = vst.msk [vmem:[#allocation2 + $0x2] sm:$0xe] %vm60_vm3, %v68_v18 }
  0x82   :  { %328 = vrot.lane.b32.xlu0 %v766_v7, %s698_s30  ;;  %336 = vrot.lane.b32.xlu1 %v793_v9, %s698_s30 }
  0x84   :  { %v77_v19 = vpop.permute.xlu0 %76  ;;  %v81_v20 = vpop.permute.xlu1 %80 }
  0x85   :  { %79 = vst.msk [vmem:[#allocation2 + $0x5] sm:$0xe] %vm60_vm3, %v77_v19  ;;  %vm274_vm3 = vcmask 486857  }
  0x86   :  { %84 = vst.msk [vmem:[#allocation2 - $0x2] sm:$0x1c] %vm83_vm4, %v81_v20  ;;  %323 = vrot.lane.b32.xlu0 %v739_v1, %s699_s5  ;;  %332 = vrot.lane.b32.xlu1 %v774_v8, %s699_s5 }
  0x88   :  { %v91_v21 = vpop.permute.xlu0 %90  ;;  %v99_v22 = vpop.permute.xlu1 %98 }
  0x89   :  { %93 = vst.msk [vmem:[#allocation2 + $0x1] sm:$0x1c] %vm83_vm4, %v91_v21  ;;  %101 = vst.msk [vmem:[#allocation2 + $0x4] sm:$0x1c] %vm83_vm4, %v99_v22  ;;  %vm295_vm4 = vcmask 512482  }
  0x8a   :  { %340 = vrot.lane.b32.xlu0 %v802_v10, %s699_s5  ;;  %344 = vrot.lane.b32.xlu1 %v766_v7, %s700_s6  ;;  %s705_s5 = smov 87  }
  0x8c   :  { %v86_v24 = vpop.permute.xlu0 %85  ;;  %v95_v25 = vpop.permute.xlu1 %94 }
  0x8d   :  { %89 = vst.msk [vmem:[#allocation2 - $0x2] sm:$0x1c] %vm88_vm5, %v86_v24  ;;  %97 = vst.msk [vmem:[#allocation2 + $0x1] sm:$0x1c] %vm88_vm5, %v95_v25 }
  0x8e   :  { %354 = vrot.lane.b32.xlu0 %v793_v9, %s700_s6  ;;  %363 = vrot.lane.b32.xlu1 %v827_v23, %s700_s6 }
  0x90   :  { %v103_v26 = vpop.permute.xlu0 %102  ;;  %v107_v27 = vpop.permute.xlu1 %106 }
  0x91   :  { %105 = vst.msk [vmem:[#allocation2 + $0x4] sm:$0x1c] %vm88_vm5, %v103_v26  ;;  %vm300_vm5 = vcmask 537082  }
  0x92   :  { %110 = vst.msk [vmem:[#allocation2 - $0x3] sm:$0x38] %vm109_vm6, %v107_v27  ;;  %349 = vrot.lane.b32.xlu0 %v774_v8, %s701_s9  ;;  %358 = vrot.lane.b32.xlu1 %v802_v10, %s701_s9 }
  0x94   :  { %v117_v29 = vpop.permute.xlu0 %116  ;;  %v125_v30 = vpop.permute.xlu1 %124 }
  0x95   :  { %119 = vst.msk [vmem:[#allocation2] sm:$0x38] %vm109_vm6, %v117_v29  ;;  %127 = vst.msk [vmem:[#allocation2 + $0x3] sm:$0x38] %vm109_vm6, %v125_v30  ;;  %vm321_vm6 = vcmask 562707  }
  0x96   :  { %368 = vrot.lane.b32.xlu0 %v836_v28, %s701_s9  ;;  %372 = vrot.lane.b32.xlu1 %v766_v7, %s702_s13 }
  0x98   :  { %v112_v33 = vpop.permute.xlu0 %111  ;;  %v121_v34 = vpop.permute.xlu1 %120 }
  0x99   :  { %115 = vst.msk [vmem:[#allocation2 - $0x3] sm:$0x38] %vm114_vm7, %v112_v33  ;;  %123 = vst.msk [vmem:[#allocation2] sm:$0x38] %vm114_vm7, %v121_v34 }
  0x9a   :  { %382 = vrot.lane.b32.xlu0 %v793_v9, %s702_s13  ;;  %390 = vrot.lane.b32.xlu1 %v827_v23, %s702_s13 }
  0x9c   :  { %v129_v36 = vpop.permute.xlu0 %128  ;;  %v133_v37 = vpop.permute.xlu1 %132 }
  0x9d   :  { %131 = vst.msk [vmem:[#allocation2 + $0x3] sm:$0x38] %vm114_vm7, %v129_v36  ;;  %vm326_vm7 = vcmask 587307  }
  0x9e   :  { %136 = vst.msk [vmem:[#allocation2] sm:$0x7] %vm135_vm8, %v133_v37  ;;  %377 = vrot.lane.b32.xlu0 %v774_v8, %s703_s19  ;;  %386 = vrot.lane.b32.xlu1 %v802_v10, %s703_s19 }
  0xa0   :  { %v143_v40 = vpop.permute.xlu0 %142  ;;  %v152_v41 = vpop.permute.xlu1 %151 }
  0xa1   :  { %145 = vst.msk [vmem:[#allocation2 + $0x3] sm:$0x7] %vm135_vm8, %v143_v40  ;;  %154 = vst.msk [vmem:[#allocation2 + $0x6] sm:$0x7] %vm135_vm8, %v152_v41  ;;  %vm347_vm8 = vcmask 608832  }
  0xa2   :  { %394 = vrot.lane.b32.xlu0 %v836_v28, %s703_s19  ;;  %398 = vrot.lane.b32.xlu1 %v766_v7, %s704_s24 }
  0xa4   :  { %v138_v43 = vpop.permute.xlu0 %137  ;;  %v147_v44 = vpop.permute.xlu1 %146 }
  0xa5   :  { %141 = vst.msk [vmem:[#allocation2] sm:$0x7] %vm140_vm9, %v138_v43  ;;  %149 = vst.msk [vmem:[#allocation2 + $0x3] sm:$0x7] %vm140_vm9, %v147_v44 }
  0xa6   :  { %408 = vrot.lane.b32.xlu0 %v793_v9, %s704_s24  ;;  %416 = vrot.lane.b32.xlu1 %v827_v23, %s704_s24 }
  0xa8   :  { %v157_v47 = vpop.permute.xlu0 %156  ;;  %v161_v48 = vpop.permute.xlu1 %160 }
  0xa9   :  { %159 = vst.msk [vmem:[#allocation2 + $0x6] sm:$0x7] %vm140_vm9, %v157_v47  ;;  %vm352_vm9 = vcmask 633432  }
  0xaa   :  { %164 = vst.msk [vmem:[#allocation2 - $0x1] sm:$0xe] %vm163_vm10, %v161_v48  ;;  %403 = vrot.lane.b32.xlu0 %v774_v8, %s705_s5  ;;  %412 = vrot.lane.b32.xlu1 %v802_v10, %s705_s5 }
  0xac   :  { %v171_v50 = vpop.permute.xlu0 %170  ;;  %v179_v51 = vpop.permute.xlu1 %178 }
  0xad   :  { %173 = vst.msk [vmem:[#allocation2 + $0x2] sm:$0xe] %vm163_vm10, %v171_v50  ;;  %181 = vst.msk [vmem:[#allocation2 + $0x5] sm:$0xe] %vm163_vm10, %v179_v51  ;;  %vm375_vm10 = vcmask 659057  }
  0xae   :  { %420 = vrot.lane.b32.xlu0 %v836_v28, %s705_s5  ;;  %424 = vrot.lane.b32.xlu1 %v766_v7, %s706_s8 }
  0xb0   :  { %v166_v54 = vpop.permute.xlu0 %165  ;;  %v175_v55 = vpop.permute.xlu1 %174 }
  0xb1   :  { %169 = vst.msk [vmem:[#allocation2 - $0x1] sm:$0xe] %vm168_vm11, %v166_v54  ;;  %177 = vst.msk [vmem:[#allocation2 + $0x2] sm:$0xe] %vm168_vm11, %v175_v55 }
  0xb2   :  { %434 = vrot.lane.b32.xlu0 %v793_v9, %s706_s8  ;;  %442 = vrot.lane.b32.xlu1 %v827_v23, %s706_s8 }
  0xb4   :  { %v183_v57 = vpop.permute.xlu0 %182  ;;  %v187_v58 = vpop.permute.xlu1 %186 }
  0xb5   :  { %185 = vst.msk [vmem:[#allocation2 + $0x5] sm:$0xe] %vm168_vm11, %v183_v57  ;;  %vm380_vm11 = vcmask 683657  }
  0xb6   :  { %190 = vst.msk [vmem:[#allocation2 - $0x2] sm:$0x1c] %vm189_vm12, %v187_v58  ;;  %429 = vrot.lane.b32.xlu0 %v774_v8, %s707_s14  ;;  %438 = vrot.lane.b32.xlu1 %v802_v10, %s707_s14 }
  0xb8   :  { %v197_v61 = vpop.permute.xlu0 %196  ;;  %v205_v62 = vpop.permute.xlu1 %204 }
  0xb9   :  { %199 = vst.msk [vmem:[#allocation2 + $0x1] sm:$0x1c] %vm189_vm12, %v197_v61  ;;  %207 = vst.msk [vmem:[#allocation2 + $0x4] sm:$0x1c] %vm189_vm12, %v205_v62  ;;  %vm401_vm12 = vcmask 709282  }
  0xba   :  { %446 = vrot.lane.b32.xlu0 %v836_v28, %s707_s14 }
  0xbc   :  { %v192_v1 = vpop.permute.xlu0 %191  ;;  %v201_v2 = vpop.permute.xlu1 %200 }
  0xbd   :  { %195 = vst.msk [vmem:[#allocation2 - $0x2] sm:$0x1c] %vm194_vm13, %v192_v1  ;;  %203 = vst.msk [vmem:[#allocation2 + $0x1] sm:$0x1c] %vm194_vm13, %v201_v2 }
  0xc0   :  { %v209_v3 = vpop.permute.xlu0 %208  ;;  %v213_v4 = vpop.permute.xlu1 %212 }
  0xc1   :  { %211 = vst.msk [vmem:[#allocation2 + $0x4] sm:$0x1c] %vm194_vm13, %v209_v3  ;;  %vm406_vm13 = vcmask 733882  }
  0xc2   :  { %216 = vst.msk [vmem:[#allocation2 - $0x3] sm:$0x38] %vm215_vm14, %v213_v4 }
  0xc4   :  { %v223_v5 = vpop.permute.xlu0 %222  ;;  %v231_v6 = vpop.permute.xlu1 %230 }
  0xc5   :  { %225 = vst.msk [vmem:[#allocation2] sm:$0x38] %vm215_vm14, %v223_v5  ;;  %233 = vst.msk [vmem:[#allocation2 + $0x3] sm:$0x38] %vm215_vm14, %v231_v6  ;;  %vm427_vm14 = vcmask 759507  }
  0xc8   :  { %v218_v7 = vpop.permute.xlu0 %217  ;;  %v227_v8 = vpop.permute.xlu1 %226 }
  0xc9   :  { %221 = vst.msk [vmem:[#allocation2 - $0x3] sm:$0x38] %vm220_vm15, %v218_v7  ;;  %229 = vst.msk [vmem:[#allocation2] sm:$0x38] %vm220_vm15, %v227_v8 }
  0xcc   :  { %v235_v9 = vpop.permute.xlu0 %234  ;;  %v239_v10 = vpop.permute.xlu1 %238 }
  0xcd   :  { %237 = vst.msk [vmem:[#allocation2 + $0x3] sm:$0x38] %vm220_vm15, %v235_v9  ;;  %vm432_vm15 = vcmask 784107  }
  0xce   :  { %242 = vst.msk [vmem:[#allocation2] sm:$0x7] %vm241_vm0, %v239_v10 }
  0xd0   :  { %v249_v11 = vpop.permute.xlu0 %248  ;;  %v258_v12 = vpop.permute.xlu1 %257 }
  0xd1   :  { %251 = vst.msk [vmem:[#allocation2 + $0x3] sm:$0x7] %vm241_vm0, %v249_v11  ;;  %260 = vst.msk [vmem:[#allocation2 + $0x6] sm:$0x7] %vm241_vm0, %v258_v12 }
  0xd4   :  { %v244_v13 = vpop.permute.xlu0 %243  ;;  %v253_v14 = vpop.permute.xlu1 %252 }
  0xd5   :  { %247 = vst.msk [vmem:[#allocation2] sm:$0x7] %vm246_vm1, %v244_v13  ;;  %255 = vst.msk [vmem:[#allocation2 + $0x3] sm:$0x7] %vm246_vm1, %v253_v14 }
  0xd8   :  { %v263_v15 = vpop.permute.xlu0 %262  ;;  %v267_v16 = vpop.permute.xlu1 %266 }
  0xd9   :  { %265 = vst.msk [vmem:[#allocation2 + $0x6] sm:$0x7] %vm246_vm1, %v263_v15 }
  0xda   :  { %270 = vst.msk [vmem:[#allocation2 - $0x1] sm:$0xe] %vm269_vm2, %v267_v16 }
  0xdc   :  { %v277_v17 = vpop.permute.xlu0 %276  ;;  %v285_v18 = vpop.permute.xlu1 %284 }
  0xdd   :  { %279 = vst.msk [vmem:[#allocation2 + $0x2] sm:$0xe] %vm269_vm2, %v277_v17  ;;  %287 = vst.msk [vmem:[#allocation2 + $0x5] sm:$0xe] %vm269_vm2, %v285_v18 }
  0xe0   :  { %v272_v19 = vpop.permute.xlu0 %271  ;;  %v281_v20 = vpop.permute.xlu1 %280 }
  0xe1   :  { %275 = vst.msk [vmem:[#allocation2 - $0x1] sm:$0xe] %vm274_vm3, %v272_v19  ;;  %283 = vst.msk [vmem:[#allocation2 + $0x2] sm:$0xe] %vm274_vm3, %v281_v20  ;;  %v571_v20 = vlaneseq }
  0xe4   :  { %v289_v21 = vpop.permute.xlu0 %288  ;;  %v293_v22 = vpop.permute.xlu1 %292 }
  0xe5   :  { %291 = vst.msk [vmem:[#allocation2 + $0x5] sm:$0xe] %vm274_vm3, %v289_v21  ;;  %v572_v21 = vshrl.u32 %v571_v20, 7 }
  0xe6   :  { %296 = vst.msk [vmem:[#allocation2 - $0x2] sm:$0x1c] %vm295_vm4, %v293_v22  ;;  %v566_v22 = vld [vmem:[%s938_s3] sm:$0x1] }
  0xe8   :  { %v303_v23 = vpop.permute.xlu0 %302  ;;  %v311_v24 = vpop.permute.xlu1 %310 }
  0xe9   :  { %305 = vst.msk [vmem:[#allocation2 + $0x1] sm:$0x1c] %vm295_vm4, %v303_v23  ;;  %313 = vst.msk [vmem:[#allocation2 + $0x4] sm:$0x1c] %vm295_vm4, %v311_v24  ;;  %v573_v23 = vsub.s32 0, %v572_v21 }
  0xec   :  { %v298_v25 = vpop.permute.xlu0 %297  ;;  %v307_v26 = vpop.permute.xlu1 %306 }
  0xed   :  { %301 = vst.msk [vmem:[#allocation2 - $0x2] sm:$0x1c] %vm300_vm5, %v298_v25  ;;  %309 = vst.msk [vmem:[#allocation2 + $0x1] sm:$0x1c] %vm300_vm5, %v307_v26  ;;  %v568_v26 = vld [vmem:[%s938_s3 + $0x1] sm:$0x1] }
  0xf0   :  { %v315_v27 = vpop.permute.xlu0 %314  ;;  %v319_v28 = vpop.permute.xlu1 %318 }
  0xf1   :  { %317 = vst.msk [vmem:[#allocation2 + $0x4] sm:$0x1c] %vm300_vm5, %v315_v27 }
  0xf2   :  { %322 = vst.msk [vmem:[#allocation2 - $0x3] sm:$0x38] %vm321_vm6, %v319_v28 }
  0xf4   :  { %v329_v29 = vpop.permute.xlu0 %328  ;;  %v337_v30 = vpop.permute.xlu1 %336 }
  0xf5   :  { %331 = vst.msk [vmem:[#allocation2] sm:$0x38] %vm321_vm6, %v329_v29  ;;  %339 = vst.msk [vmem:[#allocation2 + $0x3] sm:$0x38] %vm321_vm6, %v337_v30 }
  0xf8   :  { %v324_v31 = vpop.permute.xlu0 %323  ;;  %v333_v32 = vpop.permute.xlu1 %332 }
  0xf9   :  { %327 = vst.msk [vmem:[#allocation2 - $0x3] sm:$0x38] %vm326_vm7, %v324_v31  ;;  %335 = vst.msk [vmem:[#allocation2] sm:$0x38] %vm326_vm7, %v333_v32 }
  0xfc   :  { %v341_v33 = vpop.permute.xlu0 %340  ;;  %v345_v34 = vpop.permute.xlu1 %344 }
  0xfd   :  { %343 = vst.msk [vmem:[#allocation2 + $0x3] sm:$0x38] %vm326_vm7, %v341_v33 }
  0xfe   :  { %348 = vst.msk [vmem:[#allocation2] sm:$0x7] %vm347_vm8, %v345_v34 }
 0x100   :  { %v355_v35 = vpop.permute.xlu0 %354  ;;  %v364_v36 = vpop.permute.xlu1 %363 }
 0x101   :  { %357 = vst.msk [vmem:[#allocation2 + $0x3] sm:$0x7] %vm347_vm8, %v355_v35  ;;  %366 = vst.msk [vmem:[#allocation2 + $0x6] sm:$0x7] %vm347_vm8, %v364_v36 }
 0x104   :  { %v350_v37 = vpop.permute.xlu0 %349  ;;  %v359_v38 = vpop.permute.xlu1 %358 }
 0x105   :  { %353 = vst.msk [vmem:[#allocation2] sm:$0x7] %vm352_vm9, %v350_v37  ;;  %361 = vst.msk [vmem:[#allocation2 + $0x3] sm:$0x7] %vm352_vm9, %v359_v38 }
 0x108   :  { %v369_v39 = vpop.permute.xlu0 %368  ;;  %v373_v40 = vpop.permute.xlu1 %372 }
 0x109   :  { %371 = vst.msk [vmem:[#allocation2 + $0x6] sm:$0x7] %vm352_vm9, %v369_v39 }
 0x10a   :  { %376 = vst.msk [vmem:[#allocation2 - $0x1] sm:$0xe] %vm375_vm10, %v373_v40 }
 0x10c   :  { %v383_v41 = vpop.permute.xlu0 %382  ;;  %v391_v42 = vpop.permute.xlu1 %390 }
 0x10d   :  { %385 = vst.msk [vmem:[#allocation2 + $0x2] sm:$0xe] %vm375_vm10, %v383_v41  ;;  %393 = vst.msk [vmem:[#allocation2 + $0x5] sm:$0xe] %vm375_vm10, %v391_v42 }
 0x110   :  { %v378_v43 = vpop.permute.xlu0 %377  ;;  %v387_v44 = vpop.permute.xlu1 %386 }
 0x111   :  { %381 = vst.msk [vmem:[#allocation2 - $0x1] sm:$0xe] %vm380_vm11, %v378_v43  ;;  %389 = vst.msk [vmem:[#allocation2 + $0x2] sm:$0xe] %vm380_vm11, %v387_v44 }
 0x114   :  { %v395_v45 = vpop.permute.xlu0 %394  ;;  %v399_v46 = vpop.permute.xlu1 %398 }
 0x115   :  { %397 = vst.msk [vmem:[#allocation2 + $0x5] sm:$0xe] %vm380_vm11, %v395_v45 }
 0x116   :  { %402 = vst.msk [vmem:[#allocation2 - $0x2] sm:$0x1c] %vm401_vm12, %v399_v46 }
 0x118   :  { %v409_v47 = vpop.permute.xlu0 %408  ;;  %v417_v48 = vpop.permute.xlu1 %416 }
 0x119   :  { %411 = vst.msk [vmem:[#allocation2 + $0x1] sm:$0x1c] %vm401_vm12, %v409_v47  ;;  %419 = vst.msk [vmem:[#allocation2 + $0x4] sm:$0x1c] %vm401_vm12, %v417_v48 }
 0x11c   :  { %v404_v49 = vpop.permute.xlu0 %403  ;;  %v413_v50 = vpop.permute.xlu1 %412 }
 0x11d   :  { %407 = vst.msk [vmem:[#allocation2 - $0x2] sm:$0x1c] %vm406_vm13, %v404_v49  ;;  %415 = vst.msk [vmem:[#allocation2 + $0x1] sm:$0x1c] %vm406_vm13, %v413_v50 }
 0x120   :  { %v421_v51 = vpop.permute.xlu0 %420  ;;  %v425_v52 = vpop.permute.xlu1 %424 }
 0x121   :  { %423 = vst.msk [vmem:[#allocation2 + $0x4] sm:$0x1c] %vm406_vm13, %v421_v51 }
 0x122   :  { %428 = vst.msk [vmem:[#allocation2 - $0x3] sm:$0x38] %vm427_vm14, %v425_v52 }
 0x124   :  { %v435_v53 = vpop.permute.xlu0 %434  ;;  %v443_v54 = vpop.permute.xlu1 %442 }
 0x125   :  { %437 = vst.msk [vmem:[#allocation2] sm:$0x38] %vm427_vm14, %v435_v53  ;;  %445 = vst.msk [vmem:[#allocation2 + $0x3] sm:$0x38] %vm427_vm14, %v443_v54 }
 0x128   :  { %v430_v55 = vpop.permute.xlu0 %429  ;;  %v439_v56 = vpop.permute.xlu1 %438 }
 0x129   :  { %433 = vst.msk [vmem:[#allocation2 - $0x3] sm:$0x38] %vm432_vm15, %v430_v55  ;;  %441 = vst.msk [vmem:[#allocation2] sm:$0x38] %vm432_vm15, %v439_v56 }
 0x12c   :  { %v447_v57 = vpop.permute.xlu0 %446 }
 0x12d   :  { %449 = vst.msk [vmem:[#allocation2 + $0x3] sm:$0x38] %vm432_vm15, %v447_v57 }
 0x134   :  { %v450_v58 = vld [vmem:[#allocation2] sm:$0xff]  ;;  %v451_v59 = vld [vmem:[#allocation2 + $0x8] sm:$0xff] }
 0x135   :  { %639 = vmatprep.mubr.f32.mxu0 %v450_v58 }
 0x136   :  { %640 = vmatmul.mubr.f32.vlgmr.msra.gmra.mxu0 %v451_v59 }
 0x1f6   :  { %v641_v60 = vpop.f32.mrf.mxu0 }
 0x1f7   :  { %v552_v62 = vmul.f32 %v641_v60, %v641_v60 }
 0x1f8   :  { %v534_v61 = vpop.f32.mrf.mxu0 }
 0x1f9   :  { %v543_v63 = vadd.f32 %v641_v60, %v534_v61  ;;  %v551_v0 = vmul.f32 %v534_v61, %v534_v61 }
 0x1fb   :  { %v544_v1 = vrot.slane %v543_v63, 4  ;;  %v553_v2 = vadd.f32 %v552_v62, %v551_v0 }
 0x1fd   :  { %v545_v3 = vadd.f32 %v544_v1, %v543_v63  ;;  %v554_v4 = vrot.slane %v553_v2, 4 }
 0x1ff   :  { %v546_v5 = vrot.slane %v545_v3, 2  ;;  %v555_v6 = vadd.f32 %v554_v4, %v553_v2 }
 0x201   :  { %v547_v7 = vadd.f32 %v546_v5, %v545_v3  ;;  %v556_v8 = vrot.slane %v555_v6, 2 }
 0x203   :  { %v548_v9 = vrot.slane %v547_v7, 1  ;;  %v557_v10 = vadd.f32 %v556_v8, %v555_v6 }
 0x205   :  { %v549_v11 = vadd.f32 %v548_v9, %v547_v7  ;;  %v558_v12 = vrot.slane %v557_v10, 1 }
 0x207   :  { %v550_v13 = vmul.f32 0.11111111, %v549_v11  ;;  %v559_v14 = vadd.f32 %v558_v12, %v557_v10 }
 0x209   :  { %v560_v15 = vmul.f32 0.11111111, %v559_v14  ;;  %v561_v16 = vmul.f32 %v550_v13, %v550_v13 }
 0x20b   :  { %v562_v17 = vsub.f32 %v560_v15, %v561_v16 }
 0x20d   :  { %v563_v18 = vmax.f32 %v562_v17, 0.0 }
 0x20f   :  { %v564_v19 = vadd.f32 1e-05, %v563_v18 }
 0x211   :  { %674 = vrsqrt.f32 %v564_v19 }
 0x21e   :  { %v675_v24 = vpop.eup %674 }
 0x21f   :  { %v567_v25 = vmul.f32 %v675_v24, %v566_v22 }
 0x221   :  { %v569_v27 = vmul.f32 %v567_v25, %v550_v13  ;;  %v574_v28 = vrot.slane %v567_v25, %v573_v23 }
 0x223   :  { %v570_v29 = vsub.f32 %v568_v26, %v569_v27  ;;  %v575_v30 = vmul.f32 %v574_v28, %v534_v61  ;;  %v576_v31 = vmul.f32 %v641_v60, %v574_v28 }
 0x225   :  { %v580_v32 = vrot.slane %v570_v29, %v573_v23 }
 0x227   :  { %v581_v33 = vadd.f32 %v580_v32, %v575_v30  ;;  %v582_v34 = vadd.f32 %v580_v32, %v576_v31 }
 0x229   :  { %583 = vst [vmem:[%s939_s4] sm:$0xff] %v581_v33  ;;  %584 = vst [vmem:[%s939_s4 + $0x8] sm:$0xff] %v582_v34 }

</bundles_post_ra>
